<compile_context>
chip_gen: v5e
topology: v5e:2x2
jax: 0.10.0
libtpu: 0.0.40
codegen_flags: <defaults>
</compile_context>

<pallas_src>
import functools

import jax
import jax.numpy as jnp
from jax.experimental import pallas as pl
from jax.experimental.pallas import tpu as pltpu


def _round_up(x, m):
    return ((x + m - 1) // m) * m


def _latent_cam_kernel(x_ref, win_ref, bin_ref, wblk_ref, bblk_ref,
                       wout_ref, bout_ref, o_ref, *, n_layers, matmul_dtype):
    # lr_mult is already folded into the weights / biases on the host.
    # fc_in
    x = x_ref[...].astype(matmul_dtype)
    net = jnp.dot(x, win_ref[...],
                  preferred_element_type=jnp.float32) + bin_ref[...]
    # hidden blocks: linear(relu(net))   (static unroll, n_layers is small)
    for i in range(n_layers):
        h = jnp.maximum(net, 0.0).astype(matmul_dtype)
        net = jnp.dot(h, wblk_ref[i],
                      preferred_element_type=jnp.float32) + bblk_ref[i]
    # fc_out
    h = jnp.maximum(net, 0.0).astype(matmul_dtype)
    out = jnp.dot(h, wout_ref[...],
                  preferred_element_type=jnp.float32) + bout_ref[...]
    o_ref[...] = out.astype(o_ref.dtype)


def latent_cam_forward(x, w_in, b_in, w_blk, b_blk, w_out, b_out, *,
                       lr_mult=1.0, block_batch=256,
                       matmul_dtype=jnp.float32):
    """x: (B, dim). Returns (B, dim)."""
    B, dim = x.shape
    n_layers, H, _ = w_blk.shape

    # ---- host-side parameter prep ------------------------------------
    # (1) Fold lr_mult into each layer's W and b (exact algebraic identity).
    s = jnp.asarray(lr_mult, jnp.float32)
    w_in, b_in = w_in * s, b_in * s
    w_blk, b_blk = w_blk * s, b_blk * s
    w_out, b_out = w_out * s, b_out * s

    # (2) Zero-pad the hidden dim to a lane-dense multiple of 128 (exact:
    #     padded units have zero weight & bias, stay 0 through ReLU).
    H_pad = _round_up(H, 128)
    if H_pad != H:
        p = H_pad - H
        w_in = jnp.pad(w_in, ((0, 0), (0, p)))
        b_in = jnp.pad(b_in, ((0, 0), (0, p)))
        w_blk = jnp.pad(w_blk, ((0, 0), (0, p), (0, p)))
        b_blk = jnp.pad(b_blk, ((0, 0), (0, 0), (0, p)))
        w_out = jnp.pad(w_out, ((0, p), (0, 0)))

    # (3) Matmul operands in matmul_dtype (bf16 on v6e/v7x halves weight DMA);
    #     biases stay f32, accumulation is f32.
    w_in = w_in.astype(matmul_dtype)
    w_blk = w_blk.astype(matmul_dtype)
    w_out = w_out.astype(matmul_dtype)
    b_in = b_in.astype(jnp.float32)
    b_blk = b_blk.astype(jnp.float32)
    b_out = b_out.astype(jnp.float32)

    # (4) Batch tiling: pad B to a multiple of the tile so every step is full.
    TB = min(block_batch, _round_up(max(B, 8), 8))
    B_pad = _round_up(B, TB)
    x_p = jnp.pad(x, ((0, B_pad - B), (0, 0))) if B_pad != B else x

    flops = 2 * B_pad * (dim * H_pad + n_layers * H_pad * H_pad + H_pad * dim)
    param_bytes = sum(int(a.size) * a.dtype.itemsize
                      for a in (w_in, b_in, w_blk, b_blk, w_out, b_out))
    io_bytes = int(x_p.size) * x_p.dtype.itemsize + B_pad * dim * x.dtype.itemsize
    cost = pl.CostEstimate(flops=flops, transcendentals=0,
                           bytes_accessed=param_bytes + io_bytes)

    kernel = functools.partial(_latent_cam_kernel,
                               n_layers=n_layers, matmul_dtype=matmul_dtype)

    out = pl.pallas_call(
        kernel,
        out_shape=jax.ShapeDtypeStruct((B_pad, dim), x.dtype),
        grid=(B_pad // TB,),
        in_specs=[
            # x: tiled over batch; weights/biases: constant index_map so they
            # stay VMEM-resident across all grid steps.
            pl.BlockSpec((TB, dim), lambda i: (i, 0)),
            pl.BlockSpec((dim, H_pad), lambda i: (0, 0)),
            pl.BlockSpec((1, H_pad), lambda i: (0, 0)),
            pl.BlockSpec((n_layers, H_pad, H_pad), lambda i: (0, 0, 0)),
            pl.BlockSpec((n_layers, 1, H_pad), lambda i: (0, 0, 0)),
            pl.BlockSpec((H_pad, dim), lambda i: (0, 0)),
            pl.BlockSpec((1, dim), lambda i: (0, 0)),
        ],
        out_specs=pl.BlockSpec((TB, dim), lambda i: (i, 0)),
        compiler_params=pltpu.CompilerParams(
            dimension_semantics=("parallel",)),
        cost_estimate=cost,
    )(x_p, w_in, b_in, w_blk, b_blk, w_out, b_out)

    return out[:B] if B_pad != B else out


def _reference(x, w_in, b_in, w_blk, b_blk, w_out, b_out, lr_mult):
    net = (x @ w_in + b_in[0]) * lr_mult
    for i in range(w_blk.shape[0]):
        net = (jnp.maximum(net, 0.0) @ w_blk[i] + b_blk[i, 0]) * lr_mult
    return (jnp.maximum(net, 0.0) @ w_out + b_out[0]) * lr_mult


if __name__ == "__main__":
    dim, hidden_dim, n_layers = 5, 64, 4
    lr_mult = 0.5
    batch = 512  # exercises the batch grid (2 x 256-row tiles)

    key = jax.random.PRNGKey(0)
    k_x, k_win, k_bin, k_wblk, k_bblk, k_wout = jax.random.split(key, 6)

    x = jax.random.normal(k_x, (batch, dim), dtype=jnp.float32)

    # Deterministic parameter init mirroring the module's shapes.
    # fc_in / blocks: kaiming-uniform style (bound = 1/sqrt(fan_in));
    # fc_out: weight ~ N(0, 0.05), bias = 0 (as in init_weights()).
    bnd_in = 1.0 / jnp.sqrt(jnp.float32(dim))
    bnd_h = 1.0 / jnp.sqrt(jnp.float32(hidden_dim))
    w_in = jax.random.uniform(k_win, (dim, hidden_dim), jnp.float32,
                              -bnd_in, bnd_in)
    b_in = jax.random.uniform(k_bin, (1, hidden_dim), jnp.float32,
                              -bnd_in, bnd_in)
    w_blk = jax.random.uniform(k_wblk, (n_layers, hidden_dim, hidden_dim),
                               jnp.float32, -bnd_h, bnd_h)
    b_blk = jax.random.uniform(k_bblk, (n_layers, 1, hidden_dim),
                               jnp.float32, -bnd_h, bnd_h)
    w_out = 0.05 * jax.random.normal(k_wout, (hidden_dim, dim), jnp.float32)
    b_out = jnp.zeros((1, dim), jnp.float32)

    ref = _reference(x, w_in, b_in, w_blk, b_blk, w_out, b_out, lr_mult)

    # f32 matmul path — tight agreement with the reference.
    out = latent_cam_forward(x, w_in, b_in, w_blk, b_blk, w_out, b_out,
                             lr_mult=lr_mult, matmul_dtype=jnp.float32)
    out = jax.block_until_ready(out)
    assert out.shape == (batch, dim)
    assert jnp.allclose(out, ref, atol=1e-4, rtol=1e-4), "f32 mismatch vs reference"

    # bf16 matmul operands (v6e/v7x MXU-native), f32 accumulation — looser tol.
    out_bf16 = latent_cam_forward(x, w_in, b_in, w_blk, b_blk, w_out, b_out,
                                  lr_mult=lr_mult, matmul_dtype=jnp.bfloat16)
    out_bf16 = jax.block_until_ready(out_bf16)
    assert jnp.allclose(out_bf16, ref, atol=5e-2, rtol=5e-2), "bf16 mismatch vs reference"

    print("KERNEL_OK")
</pallas_src>

<mosaic_0001>
module attributes {stable_mosaic.version = 11 : i64} {
  func.func @_latent_cam_kernel(%arg0: i32, %arg1: memref<256x5xf32, #tpu.memory_space<vmem>>, %arg2: memref<5x128xf32, #tpu.memory_space<vmem>>, %arg3: memref<1x128xf32, #tpu.memory_space<vmem>>, %arg4: memref<4x128x128xf32, #tpu.memory_space<vmem>>, %arg5: memref<4x1x128xf32, #tpu.memory_space<vmem>>, %arg6: memref<128x5xf32, #tpu.memory_space<vmem>>, %arg7: memref<1x5xf32, #tpu.memory_space<vmem>>, %arg8: memref<256x5xf32, #tpu.memory_space<vmem>>) attributes {dimension_semantics = [#tpu.dimension_semantics<parallel>], iteration_bounds = array<i64: 2>, scalar_prefetch = 0 : i64, scratch_operands = 0 : i64, tpu.core_type = #tpu.core_type<tc>, window_params = [{transform_indices = @transform_0, window_bounds = array<i64: 256, 5>}, {pipeline_mode = #tpu.pipeline_mode<synchronous>, transform_indices = @transform_1, window_bounds = array<i64: 5, 128>}, {pipeline_mode = #tpu.pipeline_mode<synchronous>, transform_indices = @transform_2, window_bounds = array<i64: 1, 128>}, {pipeline_mode = #tpu.pipeline_mode<synchronous>, transform_indices = @transform_3, window_bounds = array<i64: 4, 128, 128>}, {pipeline_mode = #tpu.pipeline_mode<synchronous>, transform_indices = @transform_4, window_bounds = array<i64: 4, 1, 128>}, {pipeline_mode = #tpu.pipeline_mode<synchronous>, transform_indices = @transform_5, window_bounds = array<i64: 128, 5>}, {pipeline_mode = #tpu.pipeline_mode<synchronous>, transform_indices = @transform_6, window_bounds = array<i64: 1, 5>}, {transform_indices = @transform_7, window_bounds = array<i64: 256, 5>}]} {
    %c0 = arith.constant 0 : index
    %c0_0 = arith.constant 0 : index
    %0 = vector.load %arg1[%c0, %c0_0] : memref<256x5xf32, #tpu.memory_space<vmem>>, vector<256x5xf32>
    %c0_1 = arith.constant 0 : index
    %c0_2 = arith.constant 0 : index
    %1 = vector.load %arg2[%c0_1, %c0_2] : memref<5x128xf32, #tpu.memory_space<vmem>>, vector<5x128xf32>
    %cst = arith.constant dense<0.000000e+00> : vector<256x128xf32>
    %2 = tpu.matmul %0, %1, %cst {dimension_numbers = #tpu.dot_dimension_numbers<[1], [0], [0], [1], [0, 0, 1, 1], [], []>} : vector<256x5xf32>, vector<5x128xf32>, vector<256x128xf32> -> vector<256x128xf32>
    %c0_3 = arith.constant 0 : index
    %c0_4 = arith.constant 0 : index
    %3 = vector.load %arg3[%c0_3, %c0_4] : memref<1x128xf32, #tpu.memory_space<vmem>>, vector<1x128xf32>
    %4 = vector.broadcast %3 : vector<1x128xf32> to vector<256x128xf32>
    %5 = arith.addf %2, %4 : vector<256x128xf32>
    %cst_5 = arith.constant 0.000000e+00 : f32
    %6 = vector.broadcast %cst_5 : f32 to vector<256x128xf32>
    %7 = arith.maximumf %5, %6 : vector<256x128xf32>
    %c0_6 = arith.constant 0 : index
    %c0_7 = arith.constant 0 : index
    %c0_8 = arith.constant 0 : index
    %8 = vector.load %arg4[%c0_6, %c0_7, %c0_8] : memref<4x128x128xf32, #tpu.memory_space<vmem>>, vector<1x128x128xf32>
    %9 = vector.shape_cast %8 : vector<1x128x128xf32> to vector<128x128xf32>
    %cst_9 = arith.constant dense<0.000000e+00> : vector<256x128xf32>
    %10 = tpu.matmul %7, %9, %cst_9 {dimension_numbers = #tpu.dot_dimension_numbers<[1], [0], [0], [1], [0, 0, 1, 1], [], []>} : vector<256x128xf32>, vector<128x128xf32>, vector<256x128xf32> -> vector<256x128xf32>
    %c0_10 = arith.constant 0 : index
    %c0_11 = arith.constant 0 : index
    %c0_12 = arith.constant 0 : index
    %11 = vector.load %arg5[%c0_10, %c0_11, %c0_12] : memref<4x1x128xf32, #tpu.memory_space<vmem>>, vector<1x1x128xf32>
    %12 = vector.shape_cast %11 : vector<1x1x128xf32> to vector<1x128xf32>
    %13 = vector.broadcast %12 : vector<1x128xf32> to vector<256x128xf32>
    %14 = arith.addf %10, %13 : vector<256x128xf32>
    %cst_13 = arith.constant 0.000000e+00 : f32
    %15 = vector.broadcast %cst_13 : f32 to vector<256x128xf32>
    %16 = arith.maximumf %14, %15 : vector<256x128xf32>
    %c1 = arith.constant 1 : index
    %c0_14 = arith.constant 0 : index
    %c0_15 = arith.constant 0 : index
    %17 = vector.load %arg4[%c1, %c0_14, %c0_15] : memref<4x128x128xf32, #tpu.memory_space<vmem>>, vector<1x128x128xf32>
    %18 = vector.shape_cast %17 : vector<1x128x128xf32> to vector<128x128xf32>
    %cst_16 = arith.constant dense<0.000000e+00> : vector<256x128xf32>
    %19 = tpu.matmul %16, %18, %cst_16 {dimension_numbers = #tpu.dot_dimension_numbers<[1], [0], [0], [1], [0, 0, 1, 1], [], []>} : vector<256x128xf32>, vector<128x128xf32>, vector<256x128xf32> -> vector<256x128xf32>
    %c1_17 = arith.constant 1 : index
    %c0_18 = arith.constant 0 : index
    %c0_19 = arith.constant 0 : index
    %20 = vector.load %arg5[%c1_17, %c0_18, %c0_19] : memref<4x1x128xf32, #tpu.memory_space<vmem>>, vector<1x1x128xf32>
    %21 = vector.shape_cast %20 : vector<1x1x128xf32> to vector<1x128xf32>
    %22 = vector.broadcast %21 : vector<1x128xf32> to vector<256x128xf32>
    %23 = arith.addf %19, %22 : vector<256x128xf32>
    %cst_20 = arith.constant 0.000000e+00 : f32
    %24 = vector.broadcast %cst_20 : f32 to vector<256x128xf32>
    %25 = arith.maximumf %23, %24 : vector<256x128xf32>
    %c2 = arith.constant 2 : index
    %c0_21 = arith.constant 0 : index
    %c0_22 = arith.constant 0 : index
    %26 = vector.load %arg4[%c2, %c0_21, %c0_22] : memref<4x128x128xf32, #tpu.memory_space<vmem>>, vector<1x128x128xf32>
    %27 = vector.shape_cast %26 : vector<1x128x128xf32> to vector<128x128xf32>
    %cst_23 = arith.constant dense<0.000000e+00> : vector<256x128xf32>
    %28 = tpu.matmul %25, %27, %cst_23 {dimension_numbers = #tpu.dot_dimension_numbers<[1], [0], [0], [1], [0, 0, 1, 1], [], []>} : vector<256x128xf32>, vector<128x128xf32>, vector<256x128xf32> -> vector<256x128xf32>
    %c2_24 = arith.constant 2 : index
    %c0_25 = arith.constant 0 : index
    %c0_26 = arith.constant 0 : index
    %29 = vector.load %arg5[%c2_24, %c0_25, %c0_26] : memref<4x1x128xf32, #tpu.memory_space<vmem>>, vector<1x1x128xf32>
    %30 = vector.shape_cast %29 : vector<1x1x128xf32> to vector<1x128xf32>
    %31 = vector.broadcast %30 : vector<1x128xf32> to vector<256x128xf32>
    %32 = arith.addf %28, %31 : vector<256x128xf32>
    %cst_27 = arith.constant 0.000000e+00 : f32
    %33 = vector.broadcast %cst_27 : f32 to vector<256x128xf32>
    %34 = arith.maximumf %32, %33 : vector<256x128xf32>
    %c3 = arith.constant 3 : index
    %c0_28 = arith.constant 0 : index
    %c0_29 = arith.constant 0 : index
    %35 = vector.load %arg4[%c3, %c0_28, %c0_29] : memref<4x128x128xf32, #tpu.memory_space<vmem>>, vector<1x128x128xf32>
    %36 = vector.shape_cast %35 : vector<1x128x128xf32> to vector<128x128xf32>
    %cst_30 = arith.constant dense<0.000000e+00> : vector<256x128xf32>
    %37 = tpu.matmul %34, %36, %cst_30 {dimension_numbers = #tpu.dot_dimension_numbers<[1], [0], [0], [1], [0, 0, 1, 1], [], []>} : vector<256x128xf32>, vector<128x128xf32>, vector<256x128xf32> -> vector<256x128xf32>
    %c3_31 = arith.constant 3 : index
    %c0_32 = arith.constant 0 : index
    %c0_33 = arith.constant 0 : index
    %38 = vector.load %arg5[%c3_31, %c0_32, %c0_33] : memref<4x1x128xf32, #tpu.memory_space<vmem>>, vector<1x1x128xf32>
    %39 = vector.shape_cast %38 : vector<1x1x128xf32> to vector<1x128xf32>
    %40 = vector.broadcast %39 : vector<1x128xf32> to vector<256x128xf32>
    %41 = arith.addf %37, %40 : vector<256x128xf32>
    %cst_34 = arith.constant 0.000000e+00 : f32
    %42 = vector.broadcast %cst_34 : f32 to vector<256x128xf32>
    %43 = arith.maximumf %41, %42 : vector<256x128xf32>
    %c0_35 = arith.constant 0 : index
    %c0_36 = arith.constant 0 : index
    %44 = vector.load %arg6[%c0_35, %c0_36] : memref<128x5xf32, #tpu.memory_space<vmem>>, vector<128x5xf32>
    %cst_37 = arith.constant dense<0.000000e+00> : vector<256x5xf32>
    %45 = tpu.matmul %43, %44, %cst_37 {dimension_numbers = #tpu.dot_dimension_numbers<[1], [0], [0], [1], [0, 0, 1, 1], [], []>} : vector<256x128xf32>, vector<128x5xf32>, vector<256x5xf32> -> vector<256x5xf32>
    %c0_38 = arith.constant 0 : index
    %c0_39 = arith.constant 0 : index
    %46 = vector.load %arg7[%c0_38, %c0_39] : memref<1x5xf32, #tpu.memory_space<vmem>>, vector<1x5xf32>
    %47 = vector.broadcast %46 : vector<1x5xf32> to vector<256x5xf32>
    %48 = arith.addf %45, %47 : vector<256x5xf32>
    %c0_40 = arith.constant 0 : index
    %c0_41 = arith.constant 0 : index
    %49 = vector.load %arg8[%c0_40, %c0_41] : memref<256x5xf32, #tpu.memory_space<vmem>>, vector<256x5xf32>
    tpu.vector_store %arg8[%c0_40, %c0_41], %48 {strides = array<i32>} : memref<256x5xf32, #tpu.memory_space<vmem>>, vector<256x5xf32>,
    return
  }
  func.func @transform_0(%arg0: i32) -> (i32, i32) {
    %c0_i32 = arith.constant 0 : i32
    %c0_i32_0 = arith.constant 0 : i32
    return %arg0, %c0_i32 : i32, i32
  }
  func.func @transform_1(%arg0: i32) -> (i32, i32) {
    %c0_i32 = arith.constant 0 : i32
    %c0_i32_0 = arith.constant 0 : i32
    %c0_i32_1 = arith.constant 0 : i32
    return %c0_i32, %c0_i32_0 : i32, i32
  }
  func.func @transform_2(%arg0: i32) -> (i32, i32) {
    %c0_i32 = arith.constant 0 : i32
    %c0_i32_0 = arith.constant 0 : i32
    %c0_i32_1 = arith.constant 0 : i32
    return %c0_i32, %c0_i32_0 : i32, i32
  }
  func.func @transform_3(%arg0: i32) -> (i32, i32, i32) {
    %c0_i32 = arith.constant 0 : i32
    %c0_i32_0 = arith.constant 0 : i32
    %c0_i32_1 = arith.constant 0 : i32
    %c0_i32_2 = arith.constant 0 : i32
    return %c0_i32, %c0_i32_0, %c0_i32_1 : i32, i32, i32
  }
  func.func @transform_4(%arg0: i32) -> (i32, i32, i32) {
    %c0_i32 = arith.constant 0 : i32
    %c0_i32_0 = arith.constant 0 : i32
    %c0_i32_1 = arith.constant 0 : i32
    %c0_i32_2 = arith.constant 0 : i32
    return %c0_i32, %c0_i32_0, %c0_i32_1 : i32, i32, i32
  }
  func.func @transform_5(%arg0: i32) -> (i32, i32) {
    %c0_i32 = arith.constant 0 : i32
    %c0_i32_0 = arith.constant 0 : i32
    %c0_i32_1 = arith.constant 0 : i32
    return %c0_i32, %c0_i32_0 : i32, i32
  }
  func.func @transform_6(%arg0: i32) -> (i32, i32) {
    %c0_i32 = arith.constant 0 : i32
    %c0_i32_0 = arith.constant 0 : i32
    %c0_i32_1 = arith.constant 0 : i32
    return %c0_i32, %c0_i32_0 : i32, i32
  }
  func.func @transform_7(%arg0: i32) -> (i32, i32) {
    %c0_i32 = arith.constant 0 : i32
    %c0_i32_0 = arith.constant 0 : i32
    return %arg0, %c0_i32 : i32, i32
  }
}

</mosaic_0001>

<bundles_post_ra>
// kernel: tpu_custom_call.1
= control target key start
LH: loop header
LB: loop body
LE: loop exit
PB: predicated region body
PF: predicated region fallthrough
CT: control target
= control target key end

     0   :  { %s1626_s24 = smov 0   ;;  %s2298_s0 = inlined_call_operand.vmem [shape: f32[512,5], index: 0, kind: input, shape index: {}]   ;;  %s2299_s1 = inlined_call_operand.vmem [shape: f32[5,128], index: 1, kind: input, shape index: {}]   ;;  %s2300_s2 = inlined_call_operand.vmem [shape: f32[1,128], index: 2, kind: input, shape index: {}]   ;;  %s2301_s3 = inlined_call_operand.vmem [shape: f32[4,128,128], index: 3, kind: input, shape index: {}]   ;;  %s2302_s4 = inlined_call_operand.vmem [shape: f32[4,1,128], index: 4, kind: input, shape index: {}]   ;;  %s2303_s5 = inlined_call_operand.vmem [shape: f32[128,5], index: 5, kind: input, shape index: {}]   ;;  %s2304_s6 = inlined_call_operand.vmem [shape: f32[1,5], index: 6, kind: input, shape index: {}]   ;;  %s2305_s7 = inlined_call_operand.vmem [shape: f32[512,5], index: 7, kind: output, shape index: {}]  }
   0x1 LB: > { %s1452_s25 = sadd.s32 4294967295, %s1584_s24   ;;  %p1456_p0 = scmp.ge.s32.totalorder %s1584_s24, 1  ;;  %s1584_s24 = sphi %s1626_s24, %s17_s24  }
   0x2   : > { %p238_p1 = scmp.lt.s32.totalorder %s1584_s24, 3 }
   0x4   : > { %p239_p2 = pnand %p1456_p0, %p238_p1 }
   0x5   : > { %s1457_s28 = sshll.u32 (!%p239_p2), %s1452_s25, 5 }
   0x6   : > { %242 = sbr.rel (%p239_p2) target bundleno = 1180 (0x49c), region = 48  ;;  %p271_p3 = scmp.lt.s32.totalorder (!%p239_p2), %s1457_s28, 63 }
   0xb   : > { %v314_v0 = vld [vmem:[%s2299_s1] sm:$0x1f]  ;;  %vm416_vm0 = vcmask 1044480   ;;  %s2307_s28 = smov (!%p271_p3, %s1457_s28), 63  ;;  %vm319_vm1 = vcmask 39936   ;;  %v580_v10 = vld [vmem:[%s2301_s3 + $0x78] sm:$0xff] }
   0xc   : > { %1461 = vmatpush.msk.msra.mxu0 %vm416_vm0, %v314_v0  ;;  %1547 = vmatpush.msk.msra.mxu3 %vm416_vm0, %v314_v0  ;;  %s1458_s29 = sshll.u32 %s2307_s28, 3  ;;  %v579_v11 = vld [vmem:[%s2301_s3 + $0x70] sm:$0xff]  ;;  %v578_v12 = vld [vmem:[%s2301_s3 + $0x68] sm:$0xff]  ;;  %v577_v14 = vld [vmem:[%s2301_s3 + $0x60] sm:$0xff] }
   0xd   : > { %s1645_s9 = scalar_lea.vmem %s2298_s0, %s1458_s29  ;;  %585 = vmatpush.msra.mxu1 %v580_v10  ;;  %1548 = vmatpush.msra.mxu2 %v580_v10  ;;  %v576_v15 = vld [vmem:[%s2301_s3 + $0x58] sm:$0xff]  ;;  %v575_v16 = vld [vmem:[%s2301_s3 + $0x50] sm:$0xff]  ;;  %v574_v17 = vld [vmem:[%s2301_s3 + $0x48] sm:$0xff]  ;;  %s2182_s26 = scalar_lea.vmem %s2305_s7, %s1458_s29 }
   0xe   : > { %v282_v1 = vld [vmem:[%s1645_s9] sm:$0xff]  ;;  %v283_v2 = vld [vmem:[%s1645_s9 + $0x8] sm:$0xff]  ;;  %v284_v3 = vld [vmem:[%s1645_s9 + $0x10] sm:$0xff] }
   0xf   : > { %1462 = vmatmul.msk.f32.vlgmr.msra.gmra.mxu0 %vm319_vm1, %v282_v1  ;;  %v285_v4 = vld [vmem:[%s1645_s9 + $0x18] sm:$0xff]  ;;  %v286_v5 = vld [vmem:[%s1645_s9 + $0x20] sm:$0xff]  ;;  %v287_v6 = vld [vmem:[%s1645_s9 + $0x28] sm:$0xff]  ;;  %586 = vmatpush.msra.mxu1 %v579_v11 }
  0x10   : > { %v288_v7 = vld [vmem:[%s1645_s9 + $0x30] sm:$0xff]  ;;  %v289_v8 = vld [vmem:[%s1645_s9 + $0x38] sm:$0xff]  ;;  %v290_v9 = vld [vmem:[%s1645_s9 + $0x40] sm:$0xff]  ;;  %1549 = vmatpush.msra.mxu2 %v579_v11 }
  0x11   : > { %v291_v13 = vld [vmem:[%s1645_s9 + $0x48] sm:$0xff]  ;;  %587 = vmatpush.msra.mxu1 %v578_v12  ;;  %v292_v18 = vld [vmem:[%s1645_s9 + $0x50] sm:$0xff]  ;;  %v573_v19 = vld [vmem:[%s2301_s3 + $0x40] sm:$0xff] }
  0x12   : > { %1550 = vmatpush.msra.mxu2 %v578_v12  ;;  %v572_v20 = vld [vmem:[%s2301_s3 + $0x38] sm:$0xff]  ;;  %v571_v21 = vld [vmem:[%s2301_s3 + $0x30] sm:$0xff]  ;;  %v570_v22 = vld [vmem:[%s2301_s3 + $0x28] sm:$0xff] }
  0x13   : > { %588 = vmatpush.msra.mxu1 %v577_v14  ;;  %v293_v23 = vld [vmem:[%s1645_s9 + $0x58] sm:$0xff]  ;;  %v569_v24 = vld [vmem:[%s2301_s3 + $0x20] sm:$0xff]  ;;  %v567_v26 = vld [vmem:[%s2301_s3 + $0x10] sm:$0xff] }
  0x14   : > { %1551 = vmatpush.msra.mxu2 %v577_v14  ;;  %v568_v25 = vld [vmem:[%s2301_s3 + $0x18] sm:$0xff]  ;;  %v294_v27 = vld [vmem:[%s1645_s9 + $0x60] sm:$0xff]  ;;  %v566_v28 = vld [vmem:[%s2301_s3 + $0x8] sm:$0xff] }
  0x15   : > { %589 = vmatpush.msra.mxu1 %v576_v15  ;;  %v565_v29 = vld [vmem:[%s2301_s3] sm:$0xff]  ;;  %v295_v30 = vld [vmem:[%s1645_s9 + $0x68] sm:$0xff]  ;;  %v300_v31 = vld [vmem:[%s1645_s9 + $0x90] sm:$0xff] }
  0x16   : > { %1552 = vmatpush.msra.mxu2 %v576_v15  ;;  %1480 = vmatmul.msk.f32.vlgmr.msra.gmra.mxu3 %vm319_vm1, %v300_v31  ;;  %v296_v32 = vld [vmem:[%s1645_s9 + $0x70] sm:$0xff]  ;;  %v301_v33 = vld [vmem:[%s1645_s9 + $0x98] sm:$0xff]  ;;  %v302_v35 = vld [vmem:[%s1645_s9 + $0xa0] sm:$0xff] }
  0x17   : > { %1463 = vmatmul.msk.f32.gmra.mxu0 %vm319_vm1, %v283_v2  ;;  %590 = vmatpush.msra.mxu1 %v575_v16  ;;  %v297_v34 = vld [vmem:[%s1645_s9 + $0x78] sm:$0xff]  ;;  %v1736_v36 = vld [vmem:[%s2300_s2] ss:$0 sm:$0xff]  ;;  %v303_v40 = vld [vmem:[%s1645_s9 + $0xa8] sm:$0xff] }
  0x18   : > { %1553 = vmatpush.msra.mxu2 %v575_v16  ;;  %v298_v38 = vld [vmem:[%s1645_s9 + $0x80] sm:$0xff]  ;;  %v299_v43 = vld [vmem:[%s1645_s9 + $0x88] sm:$0xff]  ;;  %v304_v45 = vld [vmem:[%s1645_s9 + $0xb0] sm:$0xff] }
  0x19   : > { %591 = vmatpush.msra.mxu1 %v574_v17  ;;  %v305_v49 = vld [vmem:[%s1645_s9 + $0xb8] sm:$0xff]  ;;  %v306_v53 = vld [vmem:[%s1645_s9 + $0xc0] sm:$0xff]  ;;  %v307_v57 = vld [vmem:[%s1645_s9 + $0xc8] sm:$0xff] }
  0x1a   : > { %1554 = vmatpush.msra.mxu2 %v574_v17  ;;  %v308_v61 = vld [vmem:[%s1645_s9 + $0xd0] sm:$0xff]  ;;  %v309_v1 = vld [vmem:[%s1645_s9 + $0xd8] sm:$0xff] }
  0x1b   : > { %592 = vmatpush.msra.mxu1 %v573_v19  ;;  %v313_v17 = vld [vmem:[%s1645_s9 + $0xf8] sm:$0xff] }
  0x1c   : > { %1555 = vmatpush.msra.mxu2 %v573_v19 }
  0x1d   : > { %593 = vmatpush.msra.mxu1 %v572_v20 }
  0x1e   : > { %1556 = vmatpush.msra.mxu2 %v572_v20  ;;  %1481 = vmatmul.msk.f32.gmra.mxu3 %vm319_vm1, %v301_v33 }
  0x1f   : > { %1464 = vmatmul.msk.f32.gmra.mxu0 %vm319_vm1, %v284_v3  ;;  %594 = vmatpush.msra.mxu1 %v571_v21 }
  0x20   : > { %1557 = vmatpush.msra.mxu2 %v571_v21 }
  0x21   : > { %595 = vmatpush.msra.mxu1 %v570_v22 }
  0x22   : > { %1558 = vmatpush.msra.mxu2 %v570_v22  ;;  %v1509_v22 = vld [vmem:[%s2301_s3 + $0xf8] sm:$0xff] }
  0x23   : > { %596 = vmatpush.msra.mxu1 %v569_v24 }
  0x24   : > { %1559 = vmatpush.msra.mxu2 %v569_v24 }
  0x25   : > { %597 = vmatpush.msra.mxu1 %v568_v25 }
  0x26   : > { %1560 = vmatpush.msra.mxu2 %v568_v25  ;;  %1482 = vmatmul.msk.f32.gmra.mxu3 %vm319_vm1, %v302_v35  ;;  %v1506_v35 = vld [vmem:[%s2301_s3 + $0xe0] sm:$0xff] }
  0x27   : > { %1465 = vmatmul.msk.f32.gmra.mxu0 %vm319_vm1, %v285_v4  ;;  %598 = vmatpush.msra.mxu1 %v567_v26 }
  0x28   : > { %1561 = vmatpush.msra.mxu2 %v567_v26  ;;  %v1508_v26 = vld [vmem:[%s2301_s3 + $0xf0] sm:$0xff] }
  0x29   : > { %599 = vmatpush.msra.mxu1 %v566_v28 }
  0x2a   : > { %1562 = vmatpush.msra.mxu2 %v566_v28 }
  0x2b   : > { %600 = vmatpush.msra.mxu1 %v565_v29 }
  0x2c   : > { %1563 = vmatpush.msra.mxu2 %v565_v29 }
  0x2e   : > { %1483 = vmatmul.msk.f32.gmra.mxu3 %vm319_vm1, %v303_v40  ;;  %752 = vmatpush.msrb.mxu2 %v1509_v22 }
  0x2f   : > { %1466 = vmatmul.msk.f32.gmra.mxu0 %vm319_vm1, %v286_v5  ;;  %v310_v5 = vld [vmem:[%s1645_s9 + $0xe0] sm:$0xff] }
  0x30   : > { %753 = vmatpush.msrb.mxu2 %v1508_v26 }
  0x36   : > { %1484 = vmatmul.msk.f32.gmra.mxu3 %vm319_vm1, %v304_v45 }
  0x37   : > { %1467 = vmatmul.msk.f32.gmra.mxu0 %vm319_vm1, %v287_v6 }
  0x3e   : > { %1485 = vmatmul.msk.f32.gmra.mxu3 %vm319_vm1, %v305_v49 }
  0x3f   : > { %1468 = vmatmul.msk.f32.gmra.mxu0 %vm319_vm1, %v288_v7 }
  0x46   : > { %1486 = vmatmul.msk.f32.gmra.mxu3 %vm319_vm1, %v306_v53 }
  0x47   : > { %1469 = vmatmul.msk.f32.gmra.mxu0 %vm319_vm1, %v289_v8 }
  0x4e   : > { %1487 = vmatmul.msk.f32.gmra.mxu3 %vm319_vm1, %v307_v57 }
  0x4f   : > { %1470 = vmatmul.msk.f32.gmra.mxu0 %vm319_vm1, %v290_v9  ;;  %v311_v9 = vld [vmem:[%s1645_s9 + $0xe8] sm:$0xff] }
  0x56   : > { %1488 = vmatmul.msk.f32.gmra.mxu3 %vm319_vm1, %v308_v61 }
  0x57   : > { %1471 = vmatmul.msk.f32.gmra.mxu0 %vm319_vm1, %v291_v13  ;;  %v312_v13 = vld [vmem:[%s1645_s9 + $0xf0] sm:$0xff] }
  0x5e   : > { %1489 = vmatmul.msk.f32.gmra.mxu3 %vm319_vm1, %v309_v1 }
  0x5f   : > { %1472 = vmatmul.msk.f32.gmra.mxu0 %vm319_vm1, %v292_v18 }
  0x66   : > { %1490 = vmatmul.msk.f32.gmra.mxu3 %vm319_vm1, %v310_v5  ;;  %v1499_v5 = vld [vmem:[%s2301_s3 + $0xa8] sm:$0xff] }
  0x67   : > { %1473 = vmatmul.msk.f32.gmra.mxu0 %vm319_vm1, %v293_v23 }
  0x6e   : > { %1491 = vmatmul.msk.f32.gmra.mxu3 %vm319_vm1, %v311_v9  ;;  %v1498_v9 = vld [vmem:[%s2301_s3 + $0xa0] sm:$0xff] }
  0x6f   : > { %1474 = vmatmul.msk.f32.gmra.mxu0 %vm319_vm1, %v294_v27 }
  0x76   : > { %1492 = vmatmul.msk.f32.gmra.mxu3 %vm319_vm1, %v312_v13  ;;  %v1497_v13 = vld [vmem:[%s2301_s3 + $0x98] sm:$0xff] }
  0x77   : > { %1475 = vmatmul.msk.f32.gmra.mxu0 %vm319_vm1, %v295_v30  ;;  %v1507_v30 = vld [vmem:[%s2301_s3 + $0xe8] sm:$0xff] }
  0x78   : > { %754 = vmatpush.msrb.mxu2 %v1507_v30 }
  0x7a   : > { %755 = vmatpush.msrb.mxu2 %v1506_v35 }
  0x7e   : > { %1493 = vmatmul.msk.f32.gmra.mxu3 %vm319_vm1, %v313_v17  ;;  %v1496_v17 = vld [vmem:[%s2301_s3 + $0x90] sm:$0xff] }
  0x7f   : > { %1476 = vmatmul.msk.f32.gmra.mxu0 %vm319_vm1, %v296_v32 }
  0x87   : > { %1477 = vmatmul.msk.f32.gmra.mxu0 %vm319_vm1, %v297_v34 }
  0x8c   : > { %v437_v37 = vpop.f32.mrf.mxu0 }
  0x8d   : > { %v438_v39 = vadd.f32 %v1736_v36, %v437_v37 }
  0x8f   : > { %1478 = vmatmul.msk.f32.gmra.mxu0 %vm319_vm1, %v298_v38  ;;  %v533_v41 = vmax.f32 %v438_v39, 0.0 }
  0x91   : > { %601 = vmatmul.f32.vlgmr.msra.gmra.mxu1 %v533_v41  ;;  %v1505_v41 = vld [vmem:[%s2301_s3 + $0xd8] sm:$0xff] }
  0x92   : > { %756 = vmatpush.msrb.mxu2 %v1505_v41 }
  0x94   : > { %v440_v42 = vpop.f32.mrf.mxu0 }
  0x95   : > { %v441_v44 = vadd.f32 %v1736_v36, %v440_v42 }
  0x97   : > { %1479 = vmatmul.msk.f32.gmra.mxu0 %vm319_vm1, %v299_v43  ;;  %v534_v46 = vmax.f32 %v441_v44, 0.0 }
  0x99   : > { %604 = vmatmul.f32.gmra.mxu1 %v534_v46  ;;  %v491_v32 = vpop.f32.mrf.mxu3  ;;  %v1504_v46 = vld [vmem:[%s2301_s3 + $0xd0] sm:$0xff] }
  0x9a   : > { %757 = vmatpush.msrb.mxu2 %v1504_v46 }
  0x9c   : > { %v443_v47 = vpop.f32.mrf.mxu0 }
  0x9d   : > { %v444_v48 = vadd.f32 %v1736_v36, %v443_v47 }
  0x9f   : > { %v535_v50 = vmax.f32 %v444_v48, 0.0 }
  0xa1   : > { %607 = vmatmul.f32.gmra.mxu1 %v535_v50  ;;  %v494_v39 = vpop.f32.mrf.mxu3  ;;  %v492_v50 = vadd.f32 %v1736_v36, %v491_v32 }
  0xa3   : > { %v551_v53 = vmax.f32 %v492_v50, 0.0 }
  0xa4   : > { %v446_v51 = vpop.f32.mrf.mxu0 }
  0xa5   : > { %v447_v52 = vadd.f32 %v1736_v36, %v446_v51  ;;  %v1503_v51 = vld [vmem:[%s2301_s3 + $0xc8] sm:$0xff] }
  0xa6   : > { %758 = vmatpush.msrb.mxu2 %v1503_v51 }
  0xa7   : > { %v536_v54 = vmax.f32 %v447_v52, 0.0 }
  0xa9   : > { %610 = vmatmul.f32.gmra.mxu1 %v536_v54  ;;  %v497_v45 = vpop.f32.mrf.mxu3  ;;  %v495_v54 = vadd.f32 %v1736_v36, %v494_v39  ;;  %v1847_v39 = vld [vmem:[%s2302_s4] ss:$0 sm:$0xff] }
  0xab   : > { %v552_v57 = vmax.f32 %v495_v54, 0.0  ;;  %v1523_v54 = vld [vmem:[%s2301_s3 + $0x160] sm:$0xff] }
  0xac   : > { %v449_v55 = vpop.f32.mrf.mxu0 }
  0xad   : > { %v450_v56 = vadd.f32 %v1736_v36, %v449_v55  ;;  %v1502_v55 = vld [vmem:[%s2301_s3 + $0xc0] sm:$0xff] }
  0xae   : > { %759 = vmatpush.msrb.mxu2 %v1502_v55 }
  0xaf   : > { %v537_v58 = vmax.f32 %v450_v56, 0.0 }
  0xb1   : > { %613 = vmatmul.f32.gmra.mxu1 %v537_v58  ;;  %v500_v52 = vpop.f32.mrf.mxu3  ;;  %v498_v58 = vadd.f32 %v1736_v36, %v497_v45 }
  0xb4   : > { %v452_v59 = vpop.f32.mrf.mxu0 }
  0xb5   : > { %v453_v60 = vadd.f32 %v1736_v36, %v452_v59  ;;  %v1501_v59 = vld [vmem:[%s2301_s3 + $0xb8] sm:$0xff] }
  0xb6   : > { %760 = vmatpush.msrb.mxu2 %v1501_v59 }
  0xb7   : > { %v538_v62 = vmax.f32 %v453_v60, 0.0  ;;  %v553_v60 = vmax.f32 %v498_v58, 0.0  ;;  %v1522_v58 = vld [vmem:[%s2301_s3 + $0x158] sm:$0xff] }
  0xb9   : > { %616 = vmatmul.f32.gmra.mxu1 %v538_v62  ;;  %v503_v56 = vpop.f32.mrf.mxu3  ;;  %v501_v62 = vadd.f32 %v1736_v36, %v500_v52 }
  0xba   : > { %v504_v1 = vadd.f32 %v1736_v36, %v503_v56 }
  0xbc   : > { %v455_v63 = vpop.f32.mrf.mxu0 }
  0xbd   : > { %v456_v0 = vadd.f32 %v1736_v36, %v455_v63  ;;  %v554_v63 = vmax.f32 %v501_v62, 0.0 }
  0xbf   : > { %v539_v2 = vmax.f32 %v456_v0, 0.0 }
  0xc1   : > { %619 = vmatmul.f32.gmra.mxu1 %v539_v2  ;;  %v506_v61 = vpop.f32.mrf.mxu3  ;;  %v1500_v2 = vld [vmem:[%s2301_s3 + $0xb0] sm:$0xff] }
  0xc2   : > { %761 = vmatpush.msrb.mxu2 %v1500_v2 }
  0xc4   : > { %v458_v3 = vpop.f32.mrf.mxu0  ;;  %762 = vmatpush.msrb.mxu2 %v1499_v5  ;;  %v1519_v5 = vld [vmem:[%s2301_s3 + $0x140] sm:$0xff] }
  0xc5   : > { %v459_v4 = vadd.f32 %v1736_v36, %v458_v3  ;;  %v555_v3 = vmax.f32 %v504_v1, 0.0 }
  0xc6   : > { %763 = vmatpush.msrb.mxu2 %v1498_v9 }
  0xc7   : > { %v540_v6 = vmax.f32 %v459_v4, 0.0  ;;  %v507_v4 = vadd.f32 %v1736_v36, %v506_v61 }
  0xc8   : > { %764 = vmatpush.msrb.mxu2 %v1497_v13 }
  0xc9   : > { %622 = vmatmul.f32.gmra.mxu1 %v540_v6  ;;  %v509_v0 = vpop.f32.mrf.mxu3 }
  0xca   : > { %765 = vmatpush.msrb.mxu2 %v1496_v17 }
  0xcc   : > { %v461_v7 = vpop.f32.mrf.mxu0 }
  0xcd   : > { %v462_v8 = vadd.f32 %v1736_v36, %v461_v7  ;;  %v556_v7 = vmax.f32 %v507_v4, 0.0 }
  0xcf   : > { %v541_v10 = vmax.f32 %v462_v8, 0.0  ;;  %v510_v8 = vadd.f32 %v1736_v36, %v509_v0  ;;  %v1520_v0 = vld [vmem:[%s2301_s3 + $0x148] sm:$0xff] }
  0xd1   : > { %625 = vmatmul.f32.gmra.mxu1 %v541_v10  ;;  %v512_v6 = vpop.f32.mrf.mxu3 }
  0xd4   : > { %v464_v11 = vpop.f32.mrf.mxu0 }
  0xd5   : > { %v465_v12 = vadd.f32 %v1736_v36, %v464_v11  ;;  %v557_v11 = vmax.f32 %v510_v8, 0.0 }
  0xd7   : > { %v542_v14 = vmax.f32 %v465_v12, 0.0  ;;  %v513_v12 = vadd.f32 %v1736_v36, %v512_v6 }
  0xd9   : > { %628 = vmatmul.f32.gmra.mxu1 %v542_v14  ;;  %v515_v10 = vpop.f32.mrf.mxu3  ;;  %v558_v14 = vmax.f32 %v513_v12, 0.0 }
  0xdc   : > { %v467_v15 = vpop.f32.mrf.mxu0 }
  0xdd   : > { %v468_v16 = vadd.f32 %v1736_v36, %v467_v15 }
  0xdf   : > { %v543_v18 = vmax.f32 %v468_v16, 0.0  ;;  %v516_v16 = vadd.f32 %v1736_v36, %v515_v10  ;;  %v1518_v10 = vld [vmem:[%s2301_s3 + $0x138] sm:$0xff] }
  0xe1   : > { %631 = vmatmul.f32.gmra.mxu1 %v543_v18  ;;  %v518_v15 = vpop.f32.mrf.mxu3  ;;  %v559_v18 = vmax.f32 %v516_v16, 0.0 }
  0xe4   : > { %v470_v19 = vpop.f32.mrf.mxu0 }
  0xe5   : > { %v471_v20 = vadd.f32 %v1736_v36, %v470_v19 }
  0xe7   : > { %v544_v21 = vmax.f32 %v471_v20, 0.0  ;;  %v519_v20 = vadd.f32 %v1736_v36, %v518_v15  ;;  %v1517_v15 = vld [vmem:[%s2301_s3 + $0x130] sm:$0xff] }
  0xe9   : > { %634 = vmatmul.f32.gmra.mxu1 %v544_v21  ;;  %v521_v19 = vpop.f32.mrf.mxu3  ;;  %v1495_v21 = vld [vmem:[%s2301_s3 + $0x88] sm:$0xff]  ;;  %v560_v22 = vmax.f32 %v519_v20, 0.0 }
  0xea   : > { %766 = vmatpush.msrb.mxu2 %v1495_v21 }
  0xec   : > { %v473_v23 = vpop.f32.mrf.mxu0 }
  0xed   : > { %v474_v24 = vadd.f32 %v1736_v36, %v473_v23  ;;  %v522_v23 = vadd.f32 %v1736_v36, %v521_v19  ;;  %v1516_v19 = vld [vmem:[%s2301_s3 + $0x128] sm:$0xff] }
  0xef   : > { %v545_v25 = vmax.f32 %v474_v24, 0.0  ;;  %v1494_v24 = vld [vmem:[%s2301_s3 + $0x80] sm:$0xff] }
  0xf0   : > { %767 = vmatpush.msrb.mxu2 %v1494_v24  ;;  %v1515_v24 = vld [vmem:[%s2301_s3 + $0x120] sm:$0xff] }
  0xf1   : > { %637 = vmatmul.f32.gmra.mxu1 %v545_v25  ;;  %v524_v25 = vpop.f32.mrf.mxu3 }
  0xf4   : > { %v476_v27 = vpop.f32.mrf.mxu0 }
  0xf5   : > { %v477_v28 = vadd.f32 %v1736_v36, %v476_v27  ;;  %v561_v27 = vmax.f32 %v522_v23, 0.0 }
  0xf7   : > { %v546_v29 = vmax.f32 %v477_v28, 0.0  ;;  %v525_v28 = vadd.f32 %v1736_v36, %v524_v25 }
  0xf9   : > { %640 = vmatmul.f32.gmra.mxu1 %v546_v29  ;;  %v527_v29 = vpop.f32.mrf.mxu3  ;;  %v562_v30 = vmax.f32 %v525_v28, 0.0 }
  0xfa   : > { %v528_v32 = vadd.f32 %v1736_v36, %v527_v29  ;;  %v1514_v29 = vld [vmem:[%s2301_s3 + $0x118] sm:$0xff] }
  0xfc   : > { %v479_v31 = vpop.f32.mrf.mxu0 }
  0xfd   : > { %v480_v33 = vadd.f32 %v1736_v36, %v479_v31 }
  0xff   : > { %v547_v34 = vmax.f32 %v480_v33, 0.0  ;;  %v563_v33 = vmax.f32 %v528_v32, 0.0 }
 0x101   : > { %643 = vmatmul.f32.gmra.mxu1 %v547_v34  ;;  %v530_v34 = vpop.f32.mrf.mxu3 }
 0x104   : > { %v482_v37 = vpop.f32.mrf.mxu0 }
 0x105   : > { %v483_v38 = vadd.f32 %v1736_v36, %v482_v37  ;;  %v531_v37 = vadd.f32 %v1736_v36, %v530_v34  ;;  %v1513_v34 = vld [vmem:[%s2301_s3 + $0x110] sm:$0xff] }
 0x107   : > { %v548_v40 = vmax.f32 %v483_v38, 0.0  ;;  %v564_v38 = vmax.f32 %v531_v37, 0.0 }
 0x109   : > { %646 = vmatmul.f32.vlgmr.msra.gmra.mxu2 %v548_v40  ;;  %v1526_v40 = vld [vmem:[%s2301_s3 + $0x178] sm:$0xff] }
 0x10a   : > { %919 = vmatpush.msrb.mxu3 %v1526_v40 }
 0x10c   : > { %v485_v42 = vpop.f32.mrf.mxu0 }
 0x10d   : > { %v486_v43 = vadd.f32 %v1736_v36, %v485_v42 }
 0x10e   : > { %v602_v26 = vpop.f32.mrf.mxu1 }
 0x10f   : > { %v549_v44 = vmax.f32 %v486_v43, 0.0  ;;  %v603_v42 = vadd.f32 %v1847_v39, %v602_v26 }
 0x111   : > { %649 = vmatmul.f32.gmra.mxu2 %v549_v44  ;;  %v698_v44 = vmax.f32 %v603_v42, 0.0  ;;  %v1543_v42 = vld [vmem:[%s2301_s3 + $0x1f8] sm:$0xff] }
 0x112   : > { %1086 = vmatpush.msrb.mxu0 %v1543_v42 }
 0x114   : > { %v488_v47 = vpop.f32.mrf.mxu0 }
 0x115   : > { %v489_v48 = vadd.f32 %v1736_v36, %v488_v47  ;;  %v1525_v36 = vld [vmem:[%s2301_s3 + $0x170] sm:$0xff] }
 0x116   : > { %v605_v31 = vpop.f32.mrf.mxu1  ;;  %920 = vmatpush.msrb.mxu3 %v1525_v36 }
 0x117   : > { %v550_v49 = vmax.f32 %v489_v48, 0.0  ;;  %v606_v45 = vadd.f32 %v1847_v39, %v605_v31 }
 0x119   : > { %652 = vmatmul.f32.gmra.mxu2 %v550_v49  ;;  %v699_v48 = vmax.f32 %v606_v45, 0.0  ;;  %v1524_v49 = vld [vmem:[%s2301_s3 + $0x168] sm:$0xff] }
 0x11a   : > { %921 = vmatpush.msrb.mxu3 %v1524_v49  ;;  %v1542_v49 = vld [vmem:[%s2301_s3 + $0x1f0] sm:$0xff] }
 0x11b   : > { %1087 = vmatpush.msrb.mxu0 %v1542_v49 }
 0x11c   : > { %922 = vmatpush.msrb.mxu3 %v1523_v54  ;;  %v1541_v54 = vld [vmem:[%s2301_s3 + $0x1e8] sm:$0xff] }
 0x11d   : > { %1088 = vmatpush.msrb.mxu0 %v1541_v54 }
 0x11e   : > { %v608_v35 = vpop.f32.mrf.mxu1  ;;  %923 = vmatpush.msrb.mxu3 %v1522_v58 }
 0x11f   : > { %v609_v50 = vadd.f32 %v1847_v39, %v608_v35  ;;  %v1512_v35 = vld [vmem:[%s2301_s3 + $0x108] sm:$0xff] }
 0x121   : > { %655 = vmatmul.f32.gmra.mxu2 %v551_v53  ;;  %v700_v53 = vmax.f32 %v609_v50, 0.0 }
 0x126   : > { %v611_v41 = vpop.f32.mrf.mxu1 }
 0x127   : > { %v612_v55 = vadd.f32 %v1847_v39, %v611_v41 }
 0x129   : > { %658 = vmatmul.f32.gmra.mxu2 %v552_v57  ;;  %v701_v57 = vmax.f32 %v612_v55, 0.0 }
 0x12e   : > { %v614_v46 = vpop.f32.mrf.mxu1 }
 0x131   : > { %661 = vmatmul.f32.gmra.mxu2 %v553_v60  ;;  %v615_v60 = vadd.f32 %v1847_v39, %v614_v46 }
 0x133   : > { %v702_v62 = vmax.f32 %v615_v60, 0.0 }
 0x136   : > { %v617_v52 = vpop.f32.mrf.mxu1 }
 0x137   : > { %v618_v2 = vadd.f32 %v1847_v39, %v617_v52 }
 0x139   : > { %664 = vmatmul.f32.gmra.mxu2 %v554_v63  ;;  %v1521_v63 = vld [vmem:[%s2301_s3 + $0x150] sm:$0xff]  ;;  %v703_v4 = vmax.f32 %v618_v2, 0.0  ;;  %v1539_v2 = vld [vmem:[%s2301_s3 + $0x1d8] sm:$0xff] }
 0x13a   : > { %924 = vmatpush.msrb.mxu3 %v1521_v63 }
 0x13c   : > { %925 = vmatpush.msrb.mxu3 %v1520_v0 }
 0x13e   : > { %v620_v59 = vpop.f32.mrf.mxu1  ;;  %926 = vmatpush.msrb.mxu3 %v1519_v5 }
 0x13f   : > { %v621_v6 = vadd.f32 %v1847_v39, %v620_v59 }
 0x140   : > { %927 = vmatpush.msrb.mxu3 %v1518_v10 }
 0x141   : > { %667 = vmatmul.f32.gmra.mxu2 %v555_v3  ;;  %v704_v9 = vmax.f32 %v621_v6, 0.0 }
 0x142   : > { %928 = vmatpush.msrb.mxu3 %v1517_v15 }
 0x144   : > { %929 = vmatpush.msrb.mxu3 %v1516_v19 }
 0x146   : > { %v623_v1 = vpop.f32.mrf.mxu1  ;;  %930 = vmatpush.msrb.mxu3 %v1515_v24 }
 0x148   : > { %931 = vmatpush.msrb.mxu3 %v1514_v29 }
 0x149   : > { %670 = vmatmul.f32.gmra.mxu2 %v556_v7 }
 0x14a   : > { %932 = vmatpush.msrb.mxu3 %v1513_v34 }
 0x14c   : > { %933 = vmatpush.msrb.mxu3 %v1512_v35 }
 0x14e   : > { %v626_v7 = vpop.f32.mrf.mxu1 }
 0x14f   : > { %v627_v16 = vadd.f32 %v1847_v39, %v626_v7 }
 0x151   : > { %673 = vmatmul.f32.gmra.mxu2 %v557_v11  ;;  %v624_v11 = vadd.f32 %v1847_v39, %v623_v1 }
 0x156   : > { %v629_v13 = vpop.f32.mrf.mxu1 }
 0x157   : > { %v630_v21 = vadd.f32 %v1847_v39, %v629_v13 }
 0x159   : > { %676 = vmatmul.f32.gmra.mxu2 %v558_v14  ;;  %v705_v14 = vmax.f32 %v624_v11, 0.0  ;;  %v707_v23 = vmax.f32 %v630_v21, 0.0 }
 0x15e   : > { %v632_v20 = vpop.f32.mrf.mxu1 }
 0x15f   : > { %v633_v26 = vadd.f32 %v1847_v39, %v632_v20 }
 0x161   : > { %679 = vmatmul.f32.gmra.mxu2 %v559_v18  ;;  %v706_v18 = vmax.f32 %v627_v16, 0.0  ;;  %v708_v28 = vmax.f32 %v633_v26, 0.0 }
 0x166   : > { %v635_v25 = vpop.f32.mrf.mxu1 }
 0x169   : > { %682 = vmatmul.f32.gmra.mxu2 %v560_v22 }
 0x16e   : > { %v638_v31 = vpop.f32.mrf.mxu1 }
 0x16f   : > { %v639_v37 = vadd.f32 %v1847_v39, %v638_v31 }
 0x171   : > { %685 = vmatmul.f32.gmra.mxu2 %v561_v27  ;;  %v710_v41 = vmax.f32 %v639_v37, 0.0  ;;  %v1534_v37 = vld [vmem:[%s2301_s3 + $0x1b0] sm:$0xff] }
 0x176   : > { %v641_v40 = vpop.f32.mrf.mxu1 }
 0x177   : > { %v642_v36 = vadd.f32 %v1847_v39, %v641_v40 }
 0x179   : > { %688 = vmatmul.f32.gmra.mxu2 %v562_v30  ;;  %v636_v30 = vadd.f32 %v1847_v39, %v635_v25  ;;  %v711_v46 = vmax.f32 %v642_v36, 0.0  ;;  %v1533_v36 = vld [vmem:[%s2301_s3 + $0x1a8] sm:$0xff] }
 0x181   : > { %691 = vmatmul.f32.gmra.mxu2 %v563_v33  ;;  %v709_v33 = vmax.f32 %v636_v30, 0.0  ;;  %v1535_v30 = vld [vmem:[%s2301_s3 + $0x1b8] sm:$0xff] }
 0x189   : > { %694 = vmatmul.f32.gmra.mxu2 %v564_v38 }
 0x18c   : > { %v1853_v43 = vpop.f32.mrf.mxu2 }
 0x18d   : > { %v648_v55 = vadd.f32 %v1847_v39, %v1853_v43  ;;  %v1965_v43 = vld [vmem:[%s2302_s4 + $0x1] ss:$0 sm:$0xff] }
 0x18f   : > { %v713_v58 = vmax.f32 %v648_v55, 0.0 }
 0x191   : > { %768 = vmatmul.f32.vlgmr.msrb.gmra.mxu2 %v698_v44  ;;  %v1511_v44 = vld [vmem:[%s2301_s3 + $0x100] sm:$0xff] }
 0x192   : > { %934 = vmatpush.msrb.mxu3 %v1511_v44 }
 0x194   : > { %v1859_v47 = vpop.f32.mrf.mxu2 }
 0x195   : > { %v651_v59 = vadd.f32 %v1847_v39, %v1859_v47 }
 0x197   : > { %v714_v63 = vmax.f32 %v651_v59, 0.0 }
 0x199   : > { %771 = vmatmul.f32.gmra.mxu2 %v699_v48  ;;  %v644_v48 = vpop.f32.mrf.mxu1 }
 0x19a   : > { %v645_v50 = vadd.f32 %v1847_v39, %v644_v48 }
 0x19c   : > { %v1865_v51 = vpop.f32.mrf.mxu2 }
 0x19d   : > { %v654_v0 = vadd.f32 %v1847_v39, %v1865_v51  ;;  %v1538_v51 = vld [vmem:[%s2301_s3 + $0x1d0] sm:$0xff] }
 0x1a1   : > { %774 = vmatmul.f32.gmra.mxu2 %v700_v53  ;;  %v712_v53 = vmax.f32 %v645_v50, 0.0 }
 0x1a4   : > { %v1871_v56 = vpop.f32.mrf.mxu2 }
 0x1a5   : > { %v657_v6 = vadd.f32 %v1847_v39, %v1871_v56  ;;  %v1537_v56 = vld [vmem:[%s2301_s3 + $0x1c8] sm:$0xff] }
 0x1a7   : > { %v716_v10 = vmax.f32 %v657_v6, 0.0 }
 0x1a9   : > { %777 = vmatmul.f32.gmra.mxu2 %v701_v57 }
 0x1ac   : > { %v1877_v61 = vpop.f32.mrf.mxu2 }
 0x1ad   : > { %v660_v13 = vadd.f32 %v1847_v39, %v1877_v61  ;;  %v1536_v61 = vld [vmem:[%s2301_s3 + $0x1c0] sm:$0xff] }
 0x1af   : > { %v717_v16 = vmax.f32 %v660_v13, 0.0  ;;  %v1529_v13 = vld [vmem:[%s2301_s3 + $0x188] sm:$0xff] }
 0x1b1   : > { %780 = vmatmul.f32.gmra.mxu2 %v702_v62  ;;  %v1540_v62 = vld [vmem:[%s2301_s3 + $0x1e0] sm:$0xff] }
 0x1b2   : > { %1089 = vmatpush.msrb.mxu0 %v1540_v62  ;;  %v1532_v62 = vld [vmem:[%s2301_s3 + $0x1a0] sm:$0xff] }
 0x1b4   : > { %v1886_v3 = vpop.f32.mrf.mxu2  ;;  %1090 = vmatpush.msrb.mxu0 %v1539_v2 }
 0x1b5   : > { %v663_v19 = vadd.f32 %v1847_v39, %v1886_v3 }
 0x1b6   : > { %1091 = vmatpush.msrb.mxu0 %v1538_v51 }
 0x1b8   : > { %1092 = vmatpush.msrb.mxu0 %v1537_v56 }
 0x1b9   : > { %783 = vmatmul.f32.gmra.mxu2 %v703_v4  ;;  %v715_v4 = vmax.f32 %v654_v0, 0.0 }
 0x1ba   : > { %1093 = vmatpush.msrb.mxu0 %v1536_v61 }
 0x1bc   : > { %v1892_v8 = vpop.f32.mrf.mxu2  ;;  %1094 = vmatpush.msrb.mxu0 %v1535_v30 }
 0x1bd   : > { %v666_v25 = vadd.f32 %v1847_v39, %v1892_v8 }
 0x1be   : > { %1095 = vmatpush.msrb.mxu0 %v1534_v37 }
 0x1bf   : > { %v719_v29 = vmax.f32 %v666_v25, 0.0 }
 0x1c0   : > { %1096 = vmatpush.msrb.mxu0 %v1533_v36 }
 0x1c1   : > { %786 = vmatmul.f32.gmra.mxu2 %v704_v9 }
 0x1c2   : > { %1097 = vmatpush.msrb.mxu0 %v1532_v62 }
 0x1c4   : > { %v1898_v12 = vpop.f32.mrf.mxu2 }
 0x1c5   : > { %v669_v31 = vadd.f32 %v1847_v39, %v1898_v12 }
 0x1c7   : > { %v720_v35 = vmax.f32 %v669_v31, 0.0 }
 0x1c9   : > { %789 = vmatmul.f32.gmra.mxu2 %v705_v14 }
 0x1cc   : > { %v1904_v17 = vpop.f32.mrf.mxu2 }
 0x1cd   : > { %v672_v40 = vadd.f32 %v1847_v39, %v1904_v17 }
 0x1cf   : > { %v721_v44 = vmax.f32 %v672_v40, 0.0 }
 0x1d1   : > { %792 = vmatmul.f32.gmra.mxu2 %v706_v18 }
 0x1d4   : > { %v1910_v22 = vpop.f32.mrf.mxu2 }
 0x1d9   : > { %795 = vmatmul.f32.gmra.mxu2 %v707_v23  ;;  %v718_v23 = vmax.f32 %v663_v19, 0.0 }
 0x1dc   : > { %v1916_v27 = vpop.f32.mrf.mxu2 }
 0x1e1   : > { %798 = vmatmul.f32.gmra.mxu2 %v708_v28 }
 0x1e4   : > { %v1922_v32 = vpop.f32.mrf.mxu2 }
 0x1e9   : > { %801 = vmatmul.f32.gmra.mxu2 %v709_v33 }
 0x1ec   : > { %v1931_v38 = vpop.f32.mrf.mxu2 }
 0x1ed   : > { %v684_v2 = vadd.f32 %v1847_v39, %v1931_v38 }
 0x1ef   : > { %v725_v6 = vmax.f32 %v684_v2, 0.0 }
 0x1f1   : > { %804 = vmatmul.f32.gmra.mxu2 %v710_v41 }
 0x1f4   : > { %v1940_v45 = vpop.f32.mrf.mxu2 }
 0x1f9   : > { %807 = vmatmul.f32.gmra.mxu2 %v711_v46  ;;  %v675_v46 = vadd.f32 %v1847_v39, %v1910_v22  ;;  %v681_v22 = vadd.f32 %v1847_v39, %v1922_v32 }
 0x1fb   : > { %v722_v50 = vmax.f32 %v675_v46, 0.0 }
 0x1fc   : > { %v1946_v52 = vpop.f32.mrf.mxu2 }
 0x201   : > { %810 = vmatmul.f32.gmra.mxu2 %v712_v53  ;;  %v678_v53 = vadd.f32 %v1847_v39, %v1916_v27 }
 0x204   : > { %v1953_v57 = vpop.f32.mrf.mxu2 }
 0x205   : > { %v693_v19 = vadd.f32 %v1847_v39, %v1953_v57  ;;  %v1246_v57 = vld [vmem:[%s2303_s5 + $0x78] sm:$0xff] }
 0x206   : > { %1251 = vmatpush.msrb.mxu1 %v1246_v57 }
 0x207   : > { %v728_v61 = vmax.f32 %v693_v19, 0.0 }
 0x209   : > { %813 = vmatmul.f32.gmra.mxu2 %v713_v58  ;;  %v723_v58 = vmax.f32 %v678_v53, 0.0  ;;  %v1242_v53 = vld [vmem:[%s2303_s5 + $0x58] sm:$0xff] }
 0x20c   : > { %v1957_v60 = vpop.f32.mrf.mxu2 }
 0x211   : > { %816 = vmatmul.f32.gmra.mxu2 %v714_v63 }
 0x214   : > { %v769_v1 = vpop.f32.mrf.mxu2 }
 0x215   : > { %v770_v47 = vadd.f32 %v1965_v43, %v769_v1  ;;  %v724_v1 = vmax.f32 %v681_v22, 0.0 }
 0x217   : > { %v865_v5 = vmax.f32 %v770_v47, 0.0  ;;  %v1531_v47 = vld [vmem:[%s2301_s3 + $0x198] sm:$0xff] }
 0x218   : > { %1098 = vmatpush.msrb.mxu0 %v1531_v47 }
 0x219   : > { %819 = vmatmul.f32.gmra.mxu2 %v715_v4  ;;  %935 = vmatmul.f32.vlgmr.msrb.gmra.mxu3 %v865_v5 }
 0x21c   : > { %v772_v7 = vpop.f32.mrf.mxu2 }
 0x21d   : > { %v773_v9 = vadd.f32 %v1965_v43, %v772_v7  ;;  %v1530_v7 = vld [vmem:[%s2301_s3 + $0x190] sm:$0xff] }
 0x21e   : > { %1099 = vmatpush.msrb.mxu0 %v1530_v7 }
 0x21f   : > { %v866_v11 = vmax.f32 %v773_v9, 0.0  ;;  %v687_v9 = vadd.f32 %v1847_v39, %v1940_v45 }
 0x220   : > { %1100 = vmatpush.msrb.mxu0 %v1529_v13 }
 0x221   : > { %822 = vmatmul.f32.gmra.mxu2 %v716_v10  ;;  %938 = vmatmul.f32.gmra.mxu3 %v866_v11  ;;  %v726_v11 = vmax.f32 %v687_v9, 0.0 }
 0x224   : > { %v775_v14 = vpop.f32.mrf.mxu2 }
 0x225   : > { %v776_v15 = vadd.f32 %v1965_v43, %v775_v14  ;;  %v690_v14 = vadd.f32 %v1847_v39, %v1946_v52 }
 0x227   : > { %v867_v18 = vmax.f32 %v776_v15, 0.0 }
 0x229   : > { %825 = vmatmul.f32.gmra.mxu2 %v717_v16  ;;  %941 = vmatmul.f32.gmra.mxu3 %v867_v18  ;;  %v727_v16 = vmax.f32 %v690_v14, 0.0  ;;  %v1528_v18 = vld [vmem:[%s2301_s3 + $0x180] sm:$0xff] }
 0x22a   : > { %1101 = vmatpush.msrb.mxu0 %v1528_v18 }
 0x22c   : > { %v778_v20 = vpop.f32.mrf.mxu2 }
 0x22d   : > { %v779_v21 = vadd.f32 %v1965_v43, %v778_v20 }
 0x22f   : > { %v868_v24 = vmax.f32 %v779_v21, 0.0 }
 0x231   : > { %828 = vmatmul.f32.gmra.mxu2 %v718_v23  ;;  %944 = vmatmul.f32.gmra.mxu3 %v868_v24  ;;  %v696_v23 = vadd.f32 %v1847_v39, %v1957_v60  ;;  %v1245_v39 = vld [vmem:[%s2303_s5 + $0x70] sm:$0xff] }
 0x232   : > { %1252 = vmatpush.msrb.mxu1 %v1245_v39 }
 0x234   : > { %v781_v26 = vpop.f32.mrf.mxu2 }
 0x235   : > { %v782_v28 = vadd.f32 %v1965_v43, %v781_v26  ;;  %v729_v26 = vmax.f32 %v696_v23, 0.0  ;;  %v1237_v23 = vld [vmem:[%s2303_s5 + $0x30] sm:$0xff] }
 0x237   : > { %v869_v3 = vmax.f32 %v782_v28, 0.0 }
 0x239   : > { %831 = vmatmul.f32.gmra.mxu2 %v719_v29  ;;  %947 = vmatmul.f32.gmra.mxu3 %v869_v3 }
 0x23c   : > { %v784_v33 = vpop.f32.mrf.mxu2 }
 0x23d   : > { %v785_v34 = vadd.f32 %v1965_v43, %v784_v33 }
 0x23f   : > { %v870_v8 = vmax.f32 %v785_v34, 0.0  ;;  %v2059_v34 = vld [vmem:[%s2302_s4 + $0x2] ss:$0 sm:$0xff] }
 0x241   : > { %834 = vmatmul.f32.gmra.mxu2 %v720_v35  ;;  %950 = vmatmul.f32.gmra.mxu3 %v870_v8  ;;  %v1244_v35 = vld [vmem:[%s2303_s5 + $0x68] sm:$0xff] }
 0x242   : > { %1253 = vmatpush.msrb.mxu1 %v1244_v35 }
 0x244   : > { %v787_v41 = vpop.f32.mrf.mxu2 }
 0x245   : > { %v788_v42 = vadd.f32 %v1965_v43, %v787_v41 }
 0x247   : > { %v871_v12 = vmax.f32 %v788_v42, 0.0 }
 0x249   : > { %837 = vmatmul.f32.gmra.mxu2 %v721_v44  ;;  %953 = vmatmul.f32.gmra.mxu3 %v871_v12  ;;  %v1243_v12 = vld [vmem:[%s2303_s5 + $0x60] sm:$0xff] }
 0x24a   : > { %1254 = vmatpush.msrb.mxu1 %v1243_v12 }
 0x24c   : > { %v790_v48 = vpop.f32.mrf.mxu2  ;;  %1255 = vmatpush.msrb.mxu1 %v1242_v53 }
 0x24d   : > { %v791_v49 = vadd.f32 %v1965_v43, %v790_v48 }
 0x24f   : > { %v872_v17 = vmax.f32 %v791_v49, 0.0 }
 0x251   : > { %840 = vmatmul.f32.gmra.mxu2 %v722_v50  ;;  %956 = vmatmul.f32.gmra.mxu3 %v872_v17 }
 0x254   : > { %v793_v54 = vpop.f32.mrf.mxu2 }
 0x255   : > { %v794_v55 = vadd.f32 %v1965_v43, %v793_v54 }
 0x257   : > { %v873_v59 = vmax.f32 %v794_v55, 0.0 }
 0x259   : > { %843 = vmatmul.f32.gmra.mxu2 %v723_v58  ;;  %959 = vmatmul.f32.gmra.mxu3 %v873_v59 }
 0x25c   : > { %v796_v63 = vpop.f32.mrf.mxu2 }
 0x25d   : > { %v797_v0 = vadd.f32 %v1965_v43, %v796_v63  ;;  %v1241_v63 = vld [vmem:[%s2303_s5 + $0x50] sm:$0xff] }
 0x25e   : > { %1256 = vmatpush.msrb.mxu1 %v1241_v63 }
 0x25f   : > { %v874_v27 = vmax.f32 %v797_v0, 0.0 }
 0x261   : > { %846 = vmatmul.f32.gmra.mxu2 %v724_v1  ;;  %962 = vmatmul.f32.gmra.mxu3 %v874_v27 }
 0x264   : > { %v799_v4 = vpop.f32.mrf.mxu2 }
 0x265   : > { %v800_v5 = vadd.f32 %v1965_v43, %v799_v4 }
 0x267   : > { %v875_v32 = vmax.f32 %v800_v5, 0.0  ;;  %v1240_v5 = vld [vmem:[%s2303_s5 + $0x48] sm:$0xff] }
 0x268   : > { %1257 = vmatpush.msrb.mxu1 %v1240_v5 }
 0x269   : > { %849 = vmatmul.f32.gmra.mxu2 %v725_v6  ;;  %965 = vmatmul.f32.gmra.mxu3 %v875_v32 }
 0x26c   : > { %v802_v51 = vpop.f32.mrf.mxu2 }
 0x26d   : > { %v803_v10 = vadd.f32 %v1965_v43, %v802_v51 }
 0x26f   : > { %v876_v38 = vmax.f32 %v803_v10, 0.0 }
 0x271   : > { %852 = vmatmul.f32.gmra.mxu2 %v726_v11  ;;  %968 = vmatmul.f32.gmra.mxu3 %v876_v38  ;;  %v1239_v11 = vld [vmem:[%s2303_s5 + $0x40] sm:$0xff] }
 0x272   : > { %1258 = vmatpush.msrb.mxu1 %v1239_v11 }
 0x274   : > { %v805_v15 = vpop.f32.mrf.mxu2 }
 0x275   : > { %v806_v56 = vadd.f32 %v1965_v43, %v805_v15 }
 0x277   : > { %v877_v45 = vmax.f32 %v806_v56, 0.0 }
 0x279   : > { %855 = vmatmul.f32.gmra.mxu2 %v727_v16  ;;  %971 = vmatmul.f32.gmra.mxu3 %v877_v45  ;;  %v1238_v45 = vld [vmem:[%s2303_s5 + $0x38] sm:$0xff] }
 0x27a   : > { %1259 = vmatpush.msrb.mxu1 %v1238_v45 }
 0x27c   : > { %v808_v20 = vpop.f32.mrf.mxu2  ;;  %1260 = vmatpush.msrb.mxu1 %v1237_v23 }
 0x27d   : > { %v809_v21 = vadd.f32 %v1965_v43, %v808_v20 }
 0x27f   : > { %v878_v52 = vmax.f32 %v809_v21, 0.0 }
 0x281   : > { %858 = vmatmul.f32.gmra.mxu2 %v728_v61  ;;  %974 = vmatmul.f32.gmra.mxu3 %v878_v52 }
 0x284   : > { %v811_v24 = vpop.f32.mrf.mxu2 }
 0x285   : > { %v812_v25 = vadd.f32 %v1965_v43, %v811_v24 }
 0x287   : > { %v879_v28 = vmax.f32 %v812_v25, 0.0 }
 0x289   : > { %861 = vmatmul.f32.gmra.mxu2 %v729_v26  ;;  %977 = vmatmul.f32.gmra.mxu3 %v879_v28 }
 0x28c   : > { %v814_v29 = vpop.f32.mrf.mxu2 }
 0x28d   : > { %v815_v3 = vadd.f32 %v1965_v43, %v814_v29 }
 0x28f   : > { %v880_v30 = vmax.f32 %v815_v3, 0.0  ;;  %v1236_v3 = vld [vmem:[%s2303_s5 + $0x28] sm:$0xff] }
 0x290   : > { %1261 = vmatpush.msrb.mxu1 %v1236_v3 }
 0x291   : > { %980 = vmatmul.f32.gmra.mxu3 %v880_v30 }
 0x294   : > { %v817_v60 = vpop.f32.mrf.mxu2 }
 0x295   : > { %v818_v31 = vadd.f32 %v1965_v43, %v817_v60 }
 0x297   : > { %v881_v33 = vmax.f32 %v818_v31, 0.0 }
 0x299   : > { %983 = vmatmul.f32.gmra.mxu3 %v881_v33 }
 0x29c   : > { %v820_v8 = vpop.f32.mrf.mxu2  ;;  %v936_v37 = vpop.f32.mrf.mxu3 }
 0x29d   : > { %v821_v40 = vadd.f32 %v1965_v43, %v820_v8  ;;  %v937_v41 = vadd.f32 %v2059_v34, %v936_v37  ;;  %v1235_v8 = vld [vmem:[%s2303_s5 + $0x20] sm:$0xff] }
 0x29e   : > { %1262 = vmatpush.msrb.mxu1 %v1235_v8 }
 0x29f   : > { %v882_v42 = vmax.f32 %v821_v40, 0.0  ;;  %v1032_v44 = vmax.f32 %v937_v41, 0.0 }
 0x2a1   : > { %986 = vmatmul.f32.gmra.mxu3 %v882_v42  ;;  %1102 = vmatmul.f32.vlgmr.msrb.gmra.mxu0 %v1032_v44 }
 0x2a4   : > { %v823_v36 = vpop.f32.mrf.mxu2  ;;  %v939_v46 = vpop.f32.mrf.mxu3 }
 0x2a5   : > { %v824_v48 = vadd.f32 %v1965_v43, %v823_v36  ;;  %v940_v49 = vadd.f32 %v2059_v34, %v939_v46  ;;  %v1234_v36 = vld [vmem:[%s2303_s5 + $0x18] sm:$0xff] }
 0x2a6   : > { %1263 = vmatpush.msrb.mxu1 %v1234_v36 }
 0x2a7   : > { %v883_v50 = vmax.f32 %v824_v48, 0.0  ;;  %v1033_v17 = vmax.f32 %v940_v49, 0.0 }
 0x2a9   : > { %989 = vmatmul.f32.gmra.mxu3 %v883_v50  ;;  %1105 = vmatmul.f32.gmra.mxu0 %v1033_v17 }
 0x2ac   : > { %v826_v54 = vpop.f32.mrf.mxu2  ;;  %v942_v55 = vpop.f32.mrf.mxu3 }
 0x2ad   : > { %v827_v58 = vadd.f32 %v1965_v43, %v826_v54  ;;  %v943_v59 = vadd.f32 %v2059_v34, %v942_v55  ;;  %v1233_v54 = vld [vmem:[%s2303_s5 + $0x10] sm:$0xff] }
 0x2ae   : > { %1264 = vmatpush.msrb.mxu1 %v1233_v54 }
 0x2af   : > { %v884_v62 = vmax.f32 %v827_v58, 0.0  ;;  %v1034_v22 = vmax.f32 %v943_v59, 0.0 }
 0x2b1   : > { %992 = vmatmul.f32.gmra.mxu3 %v884_v62  ;;  %1108 = vmatmul.f32.gmra.mxu0 %v1034_v22 }
 0x2b4   : > { %v829_v0 = vpop.f32.mrf.mxu2  ;;  %v945_v1 = vpop.f32.mrf.mxu3 }
 0x2b5   : > { %v830_v27 = vadd.f32 %v1965_v43, %v829_v0  ;;  %v946_v47 = vadd.f32 %v2059_v34, %v945_v1  ;;  %v1232_v0 = vld [vmem:[%s2303_s5 + $0x8] sm:$0xff] }
 0x2b6   : > { %1265 = vmatpush.msrb.mxu1 %v1232_v0 }
 0x2b7   : > { %v885_v2 = vmax.f32 %v830_v27, 0.0  ;;  %v1035_v4 = vmax.f32 %v946_v47, 0.0 }
 0x2b9   : > { %995 = vmatmul.f32.gmra.mxu3 %v885_v2  ;;  %1111 = vmatmul.f32.gmra.mxu0 %v1035_v4 }
 0x2bc   : > { %v832_v6 = vpop.f32.mrf.mxu2  ;;  %v948_v32 = vpop.f32.mrf.mxu3 }
 0x2bd   : > { %v833_v7 = vadd.f32 %v1965_v43, %v832_v6  ;;  %v949_v9 = vadd.f32 %v2059_v34, %v948_v32  ;;  %v1231_v6 = vld [vmem:[%s2303_s5] sm:$0xff] }
 0x2be   : > { %1266 = vmatpush.msrb.mxu1 %v1231_v6 }
 0x2bf   : > { %v886_v51 = vmax.f32 %v833_v7, 0.0  ;;  %v1036_v10 = vmax.f32 %v949_v9, 0.0 }
 0x2c1   : > { %998 = vmatmul.f32.gmra.mxu3 %v886_v51  ;;  %1114 = vmatmul.f32.gmra.mxu0 %v1036_v10 }
 0x2c4   : > { %v835_v38 = vpop.f32.mrf.mxu2  ;;  %v951_v13 = vpop.f32.mrf.mxu3 }
 0x2c5   : > { %v836_v14 = vadd.f32 %v1965_v43, %v835_v38  ;;  %v952_v15 = vadd.f32 %v2059_v34, %v951_v13 }
 0x2c7   : > { %v887_v56 = vmax.f32 %v836_v14, 0.0  ;;  %v1037_v16 = vmax.f32 %v952_v15, 0.0 }
 0x2c9   : > { %1001 = vmatmul.f32.gmra.mxu3 %v887_v56  ;;  %1117 = vmatmul.f32.gmra.mxu0 %v1037_v16 }
 0x2cc   : > { %v838_v18 = vpop.f32.mrf.mxu2  ;;  %v954_v19 = vpop.f32.mrf.mxu3 }
 0x2cd   : > { %v839_v20 = vadd.f32 %v1965_v43, %v838_v18  ;;  %v955_v21 = vadd.f32 %v2059_v34, %v954_v19 }
 0x2cf   : > { %v888_v61 = vmax.f32 %v839_v20, 0.0  ;;  %v1038_v52 = vmax.f32 %v955_v21, 0.0  ;;  %v2137_v20 = vld [vmem:[%s2302_s4 + $0x3] ss:$0 sm:$0xff] }
 0x2d1   : > { %1004 = vmatmul.f32.gmra.mxu3 %v888_v61  ;;  %1120 = vmatmul.f32.gmra.mxu0 %v1038_v52 }
 0x2d4   : > { %v841_v24 = vpop.f32.mrf.mxu2  ;;  %v957_v25 = vpop.f32.mrf.mxu3 }
 0x2d5   : > { %v842_v26 = vadd.f32 %v1965_v43, %v841_v24  ;;  %v958_v28 = vadd.f32 %v2059_v34, %v957_v25 }
 0x2d7   : > { %v889_v57 = vmax.f32 %v842_v26, 0.0  ;;  %v1039_v29 = vmax.f32 %v958_v28, 0.0 }
 0x2d9   : > { %1007 = vmatmul.f32.gmra.mxu3 %v889_v57  ;;  %1123 = vmatmul.f32.gmra.mxu0 %v1039_v29 }
 0x2dc   : > { %v844_v30 = vpop.f32.mrf.mxu2  ;;  %v960_v39 = vpop.f32.mrf.mxu3 }
 0x2dd   : > { %v845_v60 = vadd.f32 %v1965_v43, %v844_v30  ;;  %v961_v31 = vadd.f32 %v2059_v34, %v960_v39 }
 0x2df   : > { %v890_v33 = vmax.f32 %v845_v60, 0.0  ;;  %v1040_v35 = vmax.f32 %v961_v31, 0.0 }
 0x2e1   : > { %1010 = vmatmul.f32.gmra.mxu3 %v890_v33  ;;  %1126 = vmatmul.f32.gmra.mxu0 %v1040_v35 }
 0x2e4   : > { %v847_v37 = vpop.f32.mrf.mxu2  ;;  %v963_v40 = vpop.f32.mrf.mxu3 }
 0x2e5   : > { %v848_v41 = vadd.f32 %v1965_v43, %v847_v37  ;;  %v964_v42 = vadd.f32 %v2059_v34, %v963_v40 }
 0x2e7   : > { %v891_v44 = vmax.f32 %v848_v41, 0.0  ;;  %v1041_v12 = vmax.f32 %v964_v42, 0.0 }
 0x2e9   : > { %1013 = vmatmul.f32.gmra.mxu3 %v891_v44  ;;  %1129 = vmatmul.f32.gmra.mxu0 %v1041_v12 }
 0x2ec   : > { %v850_v46 = vpop.f32.mrf.mxu2  ;;  %v966_v48 = vpop.f32.mrf.mxu3 }
 0x2ed   : > { %v851_v49 = vadd.f32 %v1965_v43, %v850_v46  ;;  %v967_v50 = vadd.f32 %v2059_v34, %v966_v48 }
 0x2ef   : > { %v892_v17 = vmax.f32 %v851_v49, 0.0  ;;  %v1042_v53 = vmax.f32 %v967_v50, 0.0 }
 0x2f1   : > { %1016 = vmatmul.f32.gmra.mxu3 %v892_v17  ;;  %1132 = vmatmul.f32.gmra.mxu0 %v1042_v53 }
 0x2f4   : > { %v853_v55 = vpop.f32.mrf.mxu2  ;;  %v969_v58 = vpop.f32.mrf.mxu3 }
 0x2f5   : > { %v854_v59 = vadd.f32 %v1965_v43, %v853_v55  ;;  %v970_v62 = vadd.f32 %v2059_v34, %v969_v58 }
 0x2f7   : > { %v893_v22 = vmax.f32 %v854_v59, 0.0  ;;  %v1043_v63 = vmax.f32 %v970_v62, 0.0 }
 0x2f9   : > { %1019 = vmatmul.f32.gmra.mxu3 %v893_v22  ;;  %1135 = vmatmul.f32.gmra.mxu0 %v1043_v63 }
 0x2fc   : > { %v856_v1 = vpop.f32.mrf.mxu2  ;;  %v972_v27 = vpop.f32.mrf.mxu3 }
 0x2fd   : > { %v857_v47 = vadd.f32 %v1965_v43, %v856_v1  ;;  %v973_v2 = vadd.f32 %v2059_v34, %v972_v27 }
 0x2ff   : > { %v894_v4 = vmax.f32 %v857_v47, 0.0  ;;  %v1044_v5 = vmax.f32 %v973_v2, 0.0 }
 0x301   : > { %1022 = vmatmul.f32.gmra.mxu3 %v894_v4  ;;  %1138 = vmatmul.f32.gmra.mxu0 %v1044_v5 }
 0x304   : > { %v859_v32 = vpop.f32.mrf.mxu2  ;;  %v975_v7 = vpop.f32.mrf.mxu3 }
 0x305   : > { %v860_v9 = vadd.f32 %v1965_v43, %v859_v32  ;;  %v976_v51 = vadd.f32 %v2059_v34, %v975_v7 }
 0x307   : > { %v895_v10 = vmax.f32 %v860_v9, 0.0  ;;  %v1045_v11 = vmax.f32 %v976_v51, 0.0 }
 0x309   : > { %1025 = vmatmul.f32.gmra.mxu3 %v895_v10  ;;  %1141 = vmatmul.f32.gmra.mxu0 %v1045_v11 }
 0x30c   : > { %v862_v38 = vpop.f32.mrf.mxu2  ;;  %v978_v13 = vpop.f32.mrf.mxu3 }
 0x30d   : > { %v863_v14 = vadd.f32 %v1965_v43, %v862_v38  ;;  %v979_v15 = vadd.f32 %v2059_v34, %v978_v13 }
 0x30f   : > { %v896_v56 = vmax.f32 %v863_v14, 0.0  ;;  %v1046_v16 = vmax.f32 %v979_v15, 0.0 }
 0x311   : > { %1028 = vmatmul.f32.gmra.mxu3 %v896_v56  ;;  %1144 = vmatmul.f32.gmra.mxu0 %v1046_v16 }
 0x314   : > { %v981_v45 = vpop.f32.mrf.mxu3 }
 0x315   : > { %v982_v18 = vadd.f32 %v2059_v34, %v981_v45 }
 0x317   : > { %v1047_v19 = vmax.f32 %v982_v18, 0.0 }
 0x319   : > { %1147 = vmatmul.f32.gmra.mxu0 %v1047_v19 }
 0x31c   : > { %v984_v21 = vpop.f32.mrf.mxu3 }
 0x31d   : > { %v985_v61 = vadd.f32 %v2059_v34, %v984_v21 }
 0x31e   : > { %v1103_v43 = vpop.f32.mrf.mxu0 }
 0x31f   : > { %v1048_v52 = vmax.f32 %v985_v61, 0.0  ;;  %v1104_v23 = vadd.f32 %v2137_v20, %v1103_v43 }
 0x321   : > { %v1199_v24 = vmax.f32 %v1104_v23, 0.0  ;;  %1150 = vmatmul.f32.gmra.mxu0 %v1048_v52 }
 0x323   : > { %1267 = vmatmul.f32.vlgmr.msrb.gmra.mxu1 %v1199_v24 }
 0x324   : > { %v987_v25 = vpop.f32.mrf.mxu3 }
 0x325   : > { %v988_v26 = vadd.f32 %v2059_v34, %v987_v25 }
 0x326   : > { %v1106_v28 = vpop.f32.mrf.mxu0 }
 0x327   : > { %v1049_v57 = vmax.f32 %v988_v26, 0.0  ;;  %v1107_v29 = vadd.f32 %v2137_v20, %v1106_v28 }
 0x329   : > { %1153 = vmatmul.f32.gmra.mxu0 %v1049_v57  ;;  %v1200_v3 = vmax.f32 %v1107_v29, 0.0 }
 0x32b   : > { %1270 = vmatmul.f32.gmra.mxu1 %v1200_v3 }
 0x32c   : > { %v990_v30 = vpop.f32.mrf.mxu3 }
 0x32d   : > { %v991_v39 = vadd.f32 %v2059_v34, %v990_v30 }
 0x32e   : > { %v1109_v60 = vpop.f32.mrf.mxu0 }
 0x32f   : > { %v1050_v31 = vmax.f32 %v991_v39, 0.0  ;;  %v1110_v33 = vadd.f32 %v2137_v20, %v1109_v60 }
 0x331   : > { %1156 = vmatmul.f32.gmra.mxu0 %v1050_v31  ;;  %v1201_v35 = vmax.f32 %v1110_v33, 0.0 }
 0x333   : > { %1273 = vmatmul.f32.gmra.mxu1 %v1201_v35 }
 0x334   : > { %v993_v8 = vpop.f32.mrf.mxu3 }
 0x335   : > { %v994_v37 = vadd.f32 %v2059_v34, %v993_v8 }
 0x336   : > { %v1112_v40 = vpop.f32.mrf.mxu0 }
 0x337   : > { %v1051_v41 = vmax.f32 %v994_v37, 0.0  ;;  %v1113_v42 = vadd.f32 %v2137_v20, %v1112_v40 }
 0x339   : > { %1159 = vmatmul.f32.gmra.mxu0 %v1051_v41  ;;  %v1202_v44 = vmax.f32 %v1113_v42, 0.0 }
 0x33b   : > { %1276 = vmatmul.f32.gmra.mxu1 %v1202_v44 }
 0x33c   : > { %v996_v12 = vpop.f32.mrf.mxu3 }
 0x33d   : > { %v997_v36 = vadd.f32 %v2059_v34, %v996_v12 }
 0x33e   : > { %v1115_v46 = vpop.f32.mrf.mxu0 }
 0x33f   : > { %v1052_v48 = vmax.f32 %v997_v36, 0.0  ;;  %v1116_v49 = vadd.f32 %v2137_v20, %v1115_v46 }
 0x341   : > { %1162 = vmatmul.f32.gmra.mxu0 %v1052_v48  ;;  %v1203_v50 = vmax.f32 %v1116_v49, 0.0 }
 0x343   : > { %1279 = vmatmul.f32.gmra.mxu1 %v1203_v50 }
 0x344   : > { %v999_v17 = vpop.f32.mrf.mxu3 }
 0x345   : > { %v1000_v53 = vadd.f32 %v2059_v34, %v999_v17 }
 0x346   : > { %v1118_v54 = vpop.f32.mrf.mxu0 }
 0x347   : > { %v1053_v55 = vmax.f32 %v1000_v53, 0.0  ;;  %v1119_v58 = vadd.f32 %v2137_v20, %v1118_v54 }
 0x349   : > { %1165 = vmatmul.f32.gmra.mxu0 %v1053_v55  ;;  %v1204_v59 = vmax.f32 %v1119_v58, 0.0  ;;  %v2174_v58 = vld [vmem:[%s2304_s6] ss:$0 sm:$0xff] }
 0x34b   : > { %1282 = vmatmul.f32.gmra.mxu1 %v1204_v59 }
 0x34c   : > { %v1002_v62 = vpop.f32.mrf.mxu3 }
 0x34d   : > { %v1003_v22 = vadd.f32 %v2059_v34, %v1002_v62 }
 0x34e   : > { %v1121_v63 = vpop.f32.mrf.mxu0 }
 0x34f   : > { %v1054_v0 = vmax.f32 %v1003_v22, 0.0  ;;  %v1122_v1 = vadd.f32 %v2137_v20, %v1121_v63 }
 0x351   : > { %1168 = vmatmul.f32.gmra.mxu0 %v1054_v0  ;;  %v1205_v27 = vmax.f32 %v1122_v1, 0.0 }
 0x353   : > { %1285 = vmatmul.f32.gmra.mxu1 %v1205_v27 }
 0x354   : > { %v1005_v47 = vpop.f32.mrf.mxu3 }
 0x355   : > { %v1006_v2 = vadd.f32 %v2059_v34, %v1005_v47 }
 0x356   : > { %v1124_v4 = vpop.f32.mrf.mxu0 }
 0x357   : > { %v1055_v5 = vmax.f32 %v1006_v2, 0.0  ;;  %v1125_v6 = vadd.f32 %v2137_v20, %v1124_v4 }
 0x359   : > { %1171 = vmatmul.f32.gmra.mxu0 %v1055_v5  ;;  %v1206_v32 = vmax.f32 %v1125_v6, 0.0 }
 0x35b   : > { %1288 = vmatmul.f32.gmra.mxu1 %v1206_v32 }
 0x35c   : > { %v1008_v7 = vpop.f32.mrf.mxu3 }
 0x35d   : > { %v1009_v9 = vadd.f32 %v2059_v34, %v1008_v7 }
 0x35e   : > { %v1127_v51 = vpop.f32.mrf.mxu0 }
 0x35f   : > { %v1056_v10 = vmax.f32 %v1009_v9, 0.0  ;;  %v1128_v11 = vadd.f32 %v2137_v20, %v1127_v51 }
 0x361   : > { %v1207_v38 = vmax.f32 %v1128_v11, 0.0  ;;  %1174 = vmatmul.f32.gmra.mxu0 %v1056_v10 }
 0x363   : > { %1291 = vmatmul.f32.gmra.mxu1 %v1207_v38 }
 0x364   : > { %v1011_v13 = vpop.f32.mrf.mxu3 }
 0x365   : > { %v1012_v14 = vadd.f32 %v2059_v34, %v1011_v13 }
 0x366   : > { %v1130_v15 = vpop.f32.mrf.mxu0 }
 0x367   : > { %v1057_v56 = vmax.f32 %v1012_v14, 0.0  ;;  %v1131_v16 = vadd.f32 %v2137_v20, %v1130_v15 }
 0x369   : > { %v1208_v45 = vmax.f32 %v1131_v16, 0.0  ;;  %1177 = vmatmul.f32.gmra.mxu0 %v1057_v56 }
 0x36b   : > { %1294 = vmatmul.f32.gmra.mxu1 %v1208_v45 }
 0x36c   : > { %v1014_v18 = vpop.f32.mrf.mxu3 }
 0x36d   : > { %v1015_v19 = vadd.f32 %v2059_v34, %v1014_v18 }
 0x36e   : > { %v1133_v21 = vpop.f32.mrf.mxu0 }
 0x36f   : > { %v1058_v61 = vmax.f32 %v1015_v19, 0.0  ;;  %v1134_v43 = vadd.f32 %v2137_v20, %v1133_v21 }
 0x371   : > { %v1209_v52 = vmax.f32 %v1134_v43, 0.0  ;;  %1180 = vmatmul.f32.gmra.mxu0 %v1058_v61 }
 0x373   : > { %1297 = vmatmul.f32.gmra.mxu1 %v1209_v52 }
 0x374   : > { %v1017_v23 = vpop.f32.mrf.mxu3 }
 0x375   : > { %v1018_v24 = vadd.f32 %v2059_v34, %v1017_v23 }
 0x376   : > { %v1136_v25 = vpop.f32.mrf.mxu0 }
 0x377   : > { %v1059_v26 = vmax.f32 %v1018_v24, 0.0  ;;  %v1137_v28 = vadd.f32 %v2137_v20, %v1136_v25 }
 0x379   : > { %v1210_v57 = vmax.f32 %v1137_v28, 0.0  ;;  %1183 = vmatmul.f32.gmra.mxu0 %v1059_v26 }
 0x37b   : > { %1300 = vmatmul.f32.gmra.mxu1 %v1210_v57 }
 0x37c   : > { %v1020_v29 = vpop.f32.mrf.mxu3 }
 0x37d   : > { %v1021_v3 = vadd.f32 %v2059_v34, %v1020_v29 }
 0x37e   : > { %v1139_v30 = vpop.f32.mrf.mxu0 }
 0x37f   : > { %v1060_v39 = vmax.f32 %v1021_v3, 0.0  ;;  %v1140_v60 = vadd.f32 %v2137_v20, %v1139_v30 }
 0x381   : > { %v1211_v31 = vmax.f32 %v1140_v60, 0.0  ;;  %1186 = vmatmul.f32.gmra.mxu0 %v1060_v39 }
 0x383   : > { %1303 = vmatmul.f32.gmra.mxu1 %v1211_v31 }
 0x384   : > { %v1023_v33 = vpop.f32.mrf.mxu3 }
 0x385   : > { %v1024_v35 = vadd.f32 %v2059_v34, %v1023_v33 }
 0x386   : > { %v1142_v8 = vpop.f32.mrf.mxu0 }
 0x387   : > { %v1061_v37 = vmax.f32 %v1024_v35, 0.0  ;;  %v1143_v40 = vadd.f32 %v2137_v20, %v1142_v8 }
 0x389   : > { %v1212_v41 = vmax.f32 %v1143_v40, 0.0  ;;  %1189 = vmatmul.f32.gmra.mxu0 %v1061_v37 }
 0x38b   : > { %1306 = vmatmul.f32.gmra.mxu1 %v1212_v41 }
 0x38c   : > { %v1026_v42 = vpop.f32.mrf.mxu3 }
 0x38d   : > { %v1027_v44 = vadd.f32 %v2059_v34, %v1026_v42 }
 0x38e   : > { %v1145_v12 = vpop.f32.mrf.mxu0 }
 0x38f   : > { %v1062_v36 = vmax.f32 %v1027_v44, 0.0  ;;  %v1146_v46 = vadd.f32 %v2137_v20, %v1145_v12 }
 0x391   : > { %v1213_v48 = vmax.f32 %v1146_v46, 0.0  ;;  %1192 = vmatmul.f32.gmra.mxu0 %v1062_v36 }
 0x393   : > { %1309 = vmatmul.f32.gmra.mxu1 %v1213_v48 }
 0x394   : > { %v1029_v49 = vpop.f32.mrf.mxu3 }
 0x395   : > { %v1030_v50 = vadd.f32 %v2059_v34, %v1029_v49 }
 0x396   : > { %v1148_v17 = vpop.f32.mrf.mxu0 }
 0x397   : > { %v1063_v53 = vmax.f32 %v1030_v50, 0.0  ;;  %v1149_v54 = vadd.f32 %v2137_v20, %v1148_v17 }
 0x399   : > { %v1214_v55 = vmax.f32 %v1149_v54, 0.0  ;;  %1195 = vmatmul.f32.gmra.mxu0 %v1063_v53 }
 0x39b   : > { %1312 = vmatmul.f32.gmra.mxu1 %v1214_v55 }
 0x39e   : > { %v1151_v59 = vpop.f32.mrf.mxu0 }
 0x39f   : > { %v1152_v62 = vadd.f32 %v2137_v20, %v1151_v59 }
 0x3a0   : > { %v1268_v34 = vpop.f32.mrf.mxu1 }
 0x3a1   : > { %v1215_v22 = vmax.f32 %v1152_v62, 0.0  ;;  %v1269_v63 = vadd.f32 %v2174_v58, %v1268_v34 }
 0x3a3   : > { %1364 = vst.msk [vmem:[%s2182_s26] sm:$0xff] %vm319_vm1, %v1269_v63  ;;  %1315 = vmatmul.f32.gmra.mxu1 %v1215_v22 }
 0x3a6   : > { %v1154_v0 = vpop.f32.mrf.mxu0 }
 0x3a7   : > { %v1155_v1 = vadd.f32 %v2137_v20, %v1154_v0 }
 0x3a8   : > { %v1271_v27 = vpop.f32.mrf.mxu1 }
 0x3a9   : > { %v1216_v47 = vmax.f32 %v1155_v1, 0.0  ;;  %v1272_v2 = vadd.f32 %v2174_v58, %v1271_v27 }
 0x3ab   : > { %1365 = vst.msk [vmem:[%s2182_s26 + $0x8] sm:$0xff] %vm319_vm1, %v1272_v2  ;;  %1318 = vmatmul.f32.gmra.mxu1 %v1216_v47 }
 0x3ae   : > { %v1157_v4 = vpop.f32.mrf.mxu0 }
 0x3af   : > { %v1158_v5 = vadd.f32 %v2137_v20, %v1157_v4 }
 0x3b0   : > { %v1274_v6 = vpop.f32.mrf.mxu1 }
 0x3b1   : > { %v1217_v32 = vmax.f32 %v1158_v5, 0.0  ;;  %v1275_v7 = vadd.f32 %v2174_v58, %v1274_v6 }
 0x3b3   : > { %1366 = vst.msk [vmem:[%s2182_s26 + $0x10] sm:$0xff] %vm319_vm1, %v1275_v7  ;;  %1321 = vmatmul.f32.gmra.mxu1 %v1217_v32 }
 0x3b6   : > { %v1160_v9 = vpop.f32.mrf.mxu0 }
 0x3b7   : > { %v1161_v51 = vadd.f32 %v2137_v20, %v1160_v9 }
 0x3b8   : > { %v1277_v10 = vpop.f32.mrf.mxu1 }
 0x3b9   : > { %v1218_v11 = vmax.f32 %v1161_v51, 0.0  ;;  %v1278_v38 = vadd.f32 %v2174_v58, %v1277_v10 }
 0x3bb   : > { %1367 = vst.msk [vmem:[%s2182_s26 + $0x18] sm:$0xff] %vm319_vm1, %v1278_v38  ;;  %1324 = vmatmul.f32.gmra.mxu1 %v1218_v11 }
 0x3be   : > { %v1163_v13 = vpop.f32.mrf.mxu0 }
 0x3bf   : > { %v1164_v14 = vadd.f32 %v2137_v20, %v1163_v13 }
 0x3c0   : > { %v1280_v15 = vpop.f32.mrf.mxu1 }
 0x3c1   : > { %v1219_v56 = vmax.f32 %v1164_v14, 0.0  ;;  %v1281_v16 = vadd.f32 %v2174_v58, %v1280_v15 }
 0x3c3   : > { %1368 = vst.msk [vmem:[%s2182_s26 + $0x20] sm:$0xff] %vm319_vm1, %v1281_v16  ;;  %1327 = vmatmul.f32.gmra.mxu1 %v1219_v56 }
 0x3c6   : > { %v1166_v45 = vpop.f32.mrf.mxu0 }
 0x3c7   : > { %v1167_v18 = vadd.f32 %v2137_v20, %v1166_v45 }
 0x3c8   : > { %v1283_v19 = vpop.f32.mrf.mxu1 }
 0x3c9   : > { %v1220_v21 = vmax.f32 %v1167_v18, 0.0  ;;  %v1284_v61 = vadd.f32 %v2174_v58, %v1283_v19 }
 0x3cb   : > { %1369 = vst.msk [vmem:[%s2182_s26 + $0x28] sm:$0xff] %vm319_vm1, %v1284_v61  ;;  %1330 = vmatmul.f32.gmra.mxu1 %v1220_v21 }
 0x3ce   : > { %v1169_v43 = vpop.f32.mrf.mxu0 }
 0x3cf   : > { %v1170_v52 = vadd.f32 %v2137_v20, %v1169_v43 }
 0x3d0   : > { %v1286_v23 = vpop.f32.mrf.mxu1 }
 0x3d1   : > { %v1221_v24 = vmax.f32 %v1170_v52, 0.0  ;;  %v1287_v25 = vadd.f32 %v2174_v58, %v1286_v23 }
 0x3d3   : > { %1370 = vst.msk [vmem:[%s2182_s26 + $0x30] sm:$0xff] %vm319_vm1, %v1287_v25  ;;  %1333 = vmatmul.f32.gmra.mxu1 %v1221_v24 }
 0x3d6   : > { %v1172_v26 = vpop.f32.mrf.mxu0 }
 0x3d7   : > { %v1173_v28 = vadd.f32 %v2137_v20, %v1172_v26 }
 0x3d8   : > { %v1289_v57 = vpop.f32.mrf.mxu1 }
 0x3d9   : > { %v1222_v29 = vmax.f32 %v1173_v28, 0.0  ;;  %v1290_v3 = vadd.f32 %v2174_v58, %v1289_v57 }
 0x3db   : > { %1371 = vst.msk [vmem:[%s2182_s26 + $0x38] sm:$0xff] %vm319_vm1, %v1290_v3  ;;  %1336 = vmatmul.f32.gmra.mxu1 %v1222_v29 }
 0x3de   : > { %v1175_v30 = vpop.f32.mrf.mxu0 }
 0x3df   : > { %v1176_v39 = vadd.f32 %v2137_v20, %v1175_v30 }
 0x3e0   : > { %v1292_v60 = vpop.f32.mrf.mxu1 }
 0x3e1   : > { %v1223_v31 = vmax.f32 %v1176_v39, 0.0  ;;  %v1293_v33 = vadd.f32 %v2174_v58, %v1292_v60 }
 0x3e3   : > { %1372 = vst.msk [vmem:[%s2182_s26 + $0x40] sm:$0xff] %vm319_vm1, %v1293_v33  ;;  %1339 = vmatmul.f32.gmra.mxu1 %v1223_v31 }
 0x3e6   : > { %v1178_v35 = vpop.f32.mrf.mxu0 }
 0x3e7   : > { %v1179_v8 = vadd.f32 %v2137_v20, %v1178_v35 }
 0x3e8   : > { %v1295_v37 = vpop.f32.mrf.mxu1 }
 0x3e9   : > { %v1224_v40 = vmax.f32 %v1179_v8, 0.0  ;;  %v1296_v41 = vadd.f32 %v2174_v58, %v1295_v37 }
 0x3eb   : > { %1373 = vst.msk [vmem:[%s2182_s26 + $0x48] sm:$0xff] %vm319_vm1, %v1296_v41  ;;  %1342 = vmatmul.f32.gmra.mxu1 %v1224_v40 }
 0x3ee   : > { %v1181_v42 = vpop.f32.mrf.mxu0 }
 0x3ef   : > { %v1182_v44 = vadd.f32 %v2137_v20, %v1181_v42 }
 0x3f0   : > { %v1298_v12 = vpop.f32.mrf.mxu1 }
 0x3f1   : > { %v1225_v36 = vmax.f32 %v1182_v44, 0.0  ;;  %v1299_v46 = vadd.f32 %v2174_v58, %v1298_v12 }
 0x3f3   : > { %1374 = vst.msk [vmem:[%s2182_s26 + $0x50] sm:$0xff] %vm319_vm1, %v1299_v46  ;;  %1345 = vmatmul.f32.gmra.mxu1 %v1225_v36 }
 0x3f6   : > { %v1184_v48 = vpop.f32.mrf.mxu0 }
 0x3f7   : > { %v1185_v49 = vadd.f32 %v2137_v20, %v1184_v48 }
 0x3f8   : > { %v1301_v50 = vpop.f32.mrf.mxu1 }
 0x3f9   : > { %v1226_v17 = vmax.f32 %v1185_v49, 0.0  ;;  %v1302_v53 = vadd.f32 %v2174_v58, %v1301_v50 }
 0x3fb   : > { %1375 = vst.msk [vmem:[%s2182_s26 + $0x58] sm:$0xff] %vm319_vm1, %v1302_v53  ;;  %1348 = vmatmul.f32.gmra.mxu1 %v1226_v17 }
 0x3fe   : > { %v1187_v54 = vpop.f32.mrf.mxu0 }
 0x3ff   : > { %v1188_v55 = vadd.f32 %v2137_v20, %v1187_v54 }
 0x400   : > { %v1304_v59 = vpop.f32.mrf.mxu1 }
 0x401   : > { %v1227_v62 = vmax.f32 %v1188_v55, 0.0  ;;  %v1305_v34 = vadd.f32 %v2174_v58, %v1304_v59 }
 0x403   : > { %1376 = vst.msk [vmem:[%s2182_s26 + $0x60] sm:$0xff] %vm319_vm1, %v1305_v34  ;;  %1351 = vmatmul.f32.gmra.mxu1 %v1227_v62 }
 0x406   : > { %v1190_v22 = vpop.f32.mrf.mxu0 }
 0x407   : > { %v1191_v63 = vadd.f32 %v2137_v20, %v1190_v22 }
 0x408   : > { %v1307_v0 = vpop.f32.mrf.mxu1 }
 0x409   : > { %v1228_v1 = vmax.f32 %v1191_v63, 0.0  ;;  %v1308_v27 = vadd.f32 %v2174_v58, %v1307_v0 }
 0x40b   : > { %1377 = vst.msk [vmem:[%s2182_s26 + $0x68] sm:$0xff] %vm319_vm1, %v1308_v27  ;;  %1354 = vmatmul.f32.gmra.mxu1 %v1228_v1 }
 0x40e   : > { %v1193_v47 = vpop.f32.mrf.mxu0 }
 0x40f   : > { %v1194_v2 = vadd.f32 %v2137_v20, %v1193_v47 }
 0x410   : > { %v1310_v4 = vpop.f32.mrf.mxu1 }
 0x411   : > { %v1229_v5 = vmax.f32 %v1194_v2, 0.0  ;;  %v1311_v6 = vadd.f32 %v2174_v58, %v1310_v4 }
 0x413   : > { %1378 = vst.msk [vmem:[%s2182_s26 + $0x70] sm:$0xff] %vm319_vm1, %v1311_v6  ;;  %1357 = vmatmul.f32.gmra.mxu1 %v1229_v5 }
 0x416   : > { %v1196_v32 = vpop.f32.mrf.mxu0 }
 0x417   : > { %v1197_v7 = vadd.f32 %v2137_v20, %v1196_v32 }
 0x418   : > { %v1313_v9 = vpop.f32.mrf.mxu1 }
 0x419   : > { %v1230_v51 = vmax.f32 %v1197_v7, 0.0  ;;  %v1314_v10 = vadd.f32 %v2174_v58, %v1313_v9 }
 0x41b   : > { %1379 = vst.msk [vmem:[%s2182_s26 + $0x78] sm:$0xff] %vm319_vm1, %v1314_v10  ;;  %1360 = vmatmul.f32.gmra.mxu1 %v1230_v51 }
 0x420   : > { %v1316_v11 = vpop.f32.mrf.mxu1 }
 0x421   : > { %v1317_v38 = vadd.f32 %v2174_v58, %v1316_v11 }
 0x423   : > { %1380 = vst.msk [vmem:[%s2182_s26 + $0x80] sm:$0xff] %vm319_vm1, %v1317_v38 }
 0x428   : > { %v1319_v13 = vpop.f32.mrf.mxu1 }
 0x429   : > { %v1320_v14 = vadd.f32 %v2174_v58, %v1319_v13 }
 0x42b   : > { %1381 = vst.msk [vmem:[%s2182_s26 + $0x88] sm:$0xff] %vm319_vm1, %v1320_v14 }
 0x430   : > { %v1322_v20 = vpop.f32.mrf.mxu1 }
 0x431   : > { %v1323_v15 = vadd.f32 %v2174_v58, %v1322_v20 }
 0x433   : > { %1382 = vst.msk [vmem:[%s2182_s26 + $0x90] sm:$0xff] %vm319_vm1, %v1323_v15 }
 0x438   : > { %v1325_v56 = vpop.f32.mrf.mxu1 }
 0x439   : > { %v1326_v16 = vadd.f32 %v2174_v58, %v1325_v56 }
 0x43b   : > { %1383 = vst.msk [vmem:[%s2182_s26 + $0x98] sm:$0xff] %vm319_vm1, %v1326_v16 }
 0x440   : > { %v1328_v45 = vpop.f32.mrf.mxu1 }
 0x441   : > { %v1329_v18 = vadd.f32 %v2174_v58, %v1328_v45 }
 0x443   : > { %1384 = vst.msk [vmem:[%s2182_s26 + $0xa0] sm:$0xff] %vm319_vm1, %v1329_v18 }
 0x448   : > { %v1331_v19 = vpop.f32.mrf.mxu1 }
 0x449   : > { %v1332_v21 = vadd.f32 %v2174_v58, %v1331_v19 }
 0x44b   : > { %1385 = vst.msk [vmem:[%s2182_s26 + $0xa8] sm:$0xff] %vm319_vm1, %v1332_v21 }
 0x450   : > { %v1334_v61 = vpop.f32.mrf.mxu1 }
 0x451   : > { %v1335_v43 = vadd.f32 %v2174_v58, %v1334_v61 }
 0x453   : > { %1386 = vst.msk [vmem:[%s2182_s26 + $0xb0] sm:$0xff] %vm319_vm1, %v1335_v43 }
 0x458   : > { %v1337_v52 = vpop.f32.mrf.mxu1 }
 0x459   : > { %v1338_v23 = vadd.f32 %v2174_v58, %v1337_v52 }
 0x45b   : > { %1387 = vst.msk [vmem:[%s2182_s26 + $0xb8] sm:$0xff] %vm319_vm1, %v1338_v23 }
 0x460   : > { %v1340_v24 = vpop.f32.mrf.mxu1 }
 0x461   : > { %v1341_v25 = vadd.f32 %v2174_v58, %v1340_v24 }
 0x463   : > { %1388 = vst.msk [vmem:[%s2182_s26 + $0xc0] sm:$0xff] %vm319_vm1, %v1341_v25 }
 0x468   : > { %v1343_v26 = vpop.f32.mrf.mxu1 }
 0x469   : > { %v1344_v28 = vadd.f32 %v2174_v58, %v1343_v26 }
 0x46b   : > { %1389 = vst.msk [vmem:[%s2182_s26 + $0xc8] sm:$0xff] %vm319_vm1, %v1344_v28 }
 0x470   : > { %v1346_v57 = vpop.f32.mrf.mxu1 }
 0x471   : > { %v1347_v29 = vadd.f32 %v2174_v58, %v1346_v57 }
 0x473   : > { %1390 = vst.msk [vmem:[%s2182_s26 + $0xd0] sm:$0xff] %vm319_vm1, %v1347_v29 }
 0x478   : > { %v1349_v3 = vpop.f32.mrf.mxu1 }
 0x479   : > { %v1350_v30 = vadd.f32 %v2174_v58, %v1349_v3 }
 0x47b   : > { %1391 = vst.msk [vmem:[%s2182_s26 + $0xd8] sm:$0xff] %vm319_vm1, %v1350_v30 }
 0x480   : > { %v1352_v39 = vpop.f32.mrf.mxu1 }
 0x481   : > { %v1353_v60 = vadd.f32 %v2174_v58, %v1352_v39 }
 0x483   : > { %1392 = vst.msk [vmem:[%s2182_s26 + $0xe0] sm:$0xff] %vm319_vm1, %v1353_v60 }
 0x488   : > { %v1355_v31 = vpop.f32.mrf.mxu1 }
 0x489   : > { %v1356_v33 = vadd.f32 %v2174_v58, %v1355_v31 }
 0x48b   : > { %1393 = vst.msk [vmem:[%s2182_s26 + $0xe8] sm:$0xff] %vm319_vm1, %v1356_v33 }
 0x490   : > { %v1358_v35 = vpop.f32.mrf.mxu1 }
 0x491   : > { %v1359_v8 = vadd.f32 %v2174_v58, %v1358_v35 }
 0x493   : > { %1394 = vst.msk [vmem:[%s2182_s26 + $0xf0] sm:$0xff] %vm319_vm1, %v1359_v8 }
 0x498   : > { %v1361_v37 = vpop.f32.mrf.mxu1 }
 0x499   : > { %v1362_v40 = vadd.f32 %v2174_v58, %v1361_v37 }
 0x49b   : > { %1395 = vst.msk [vmem:[%s2182_s26 + $0xf8] sm:$0xff] %vm319_vm1, %v1362_v40 }
 0x49c PF: > { %s17_s24 = sadd.s32 1, %s1584_s24  }
 0x49d   : > { %p14_p4 = scmp.ge.s32.totalorder %s17_s24, 4  }
 0x49f   :  { %16 = sbr.rel (!%p14_p4) target bundleno = 1 (0x1), region = 84 }

</bundles_post_ra>
